<compile_context>
chip_gen: v7x
topology: tpu7x:2x2x1
jax: 0.10.0
libtpu: 0.0.40
codegen_flags: <defaults>
</compile_context>

<pallas_src>
import functools

import jax
import jax.numpy as jnp
from jax.experimental import pallas as pl
from jax.experimental.pallas import tpu as pltpu

LANES = 128
CONV1_C = 40
CONV2_C = 40
FC_HID = 100
N_CLASSES = 10


def _round_up(x, m):
    return (x + m - 1) // m * m


def _choose_m_tile(m, tmax=1024):
    """Pick an M tile (multiple of 8) and a padded M such that tile | padded_M."""
    m8 = _round_up(m, 8)
    if m8 <= tmax:
        return m8, m8                       # single block, no padding waste
    for tm in range(tmax, 7, -8):           # largest divisor-of-m8 tile >= 256
        if m8 % tm == 0 and tm >= 256:
            return tm, m8
    return tmax, _round_up(m8, tmax)        # fall back to padding


# ---------------------------------------------------------------------------
# Pallas kernels
# ---------------------------------------------------------------------------
def _matmul_bias_act_kernel(x_ref, w_ref, b_ref, o_ref, *, relu):
    # x: (TM, K) bf16, w: (K, Npad) bf16, b: (1, Npad) f32 -> o: (TM, Npad) f32
    acc = jnp.dot(x_ref[...], w_ref[...], preferred_element_type=jnp.float32)
    acc = acc + b_ref[...]
    if relu:
        acc = jnp.maximum(acc, 0.0)
    o_ref[...] = acc.astype(o_ref.dtype)


def matmul_bias_act(x, w, b2d, *, relu, tmax=1024):
    """y = x @ w + b (optionally ReLU); M-gridded, pipelined, lane-dense N."""
    M, K = x.shape
    Kw, Np = w.shape
    assert K == Kw and Np % LANES == 0, (x.shape, w.shape)
    tm, Mp = _choose_m_tile(M, tmax)
    if Mp != M:
        x = jnp.pad(x, ((0, Mp - M), (0, 0)))
    out = pl.pallas_call(
        functools.partial(_matmul_bias_act_kernel, relu=relu),
        out_shape=jax.ShapeDtypeStruct((Mp, Np), jnp.float32),
        grid=(Mp // tm,),
        in_specs=[
            pl.BlockSpec((tm, K), lambda i: (i, 0)),
            pl.BlockSpec((K, Np), lambda i: (0, 0)),
            pl.BlockSpec((1, Np), lambda i: (0, 0)),
        ],
        out_specs=pl.BlockSpec((tm, Np), lambda i: (i, 0)),
        compiler_params=pltpu.CompilerParams(
            dimension_semantics=("parallel",)),
    )(x.astype(jnp.bfloat16), w, b2d)
    return out[:M] if Mp != M else out


def _maxpool4_kernel(a_ref, b_ref, c_ref, d_ref, o_ref):
    # Elementwise max over the four 2x2-window corners; lane dim = C (=128).
    o_ref[...] = jnp.maximum(jnp.maximum(a_ref[...], b_ref[...]),
                             jnp.maximum(c_ref[...], d_ref[...]))


def max_pool2x2_nhwc(x, tmax=2048):
    """F.max_pool2d(x, (2, 2)) on channels-last x, staying lane-dense."""
    B, H, W, C = x.shape
    Hp, Wp = H // 2, W // 2
    M = B * Hp * Wp
    corners = [
        x[:, 0::2, 0::2, :].reshape(M, C),
        x[:, 0::2, 1::2, :].reshape(M, C),
        x[:, 1::2, 0::2, :].reshape(M, C),
        x[:, 1::2, 1::2, :].reshape(M, C),
    ]
    tm, Mp = _choose_m_tile(M, tmax)
    if Mp != M:
        corners = [jnp.pad(c, ((0, Mp - M), (0, 0))) for c in corners]
    spec = pl.BlockSpec((tm, C), lambda i: (i, 0))
    out = pl.pallas_call(
        _maxpool4_kernel,
        out_shape=jax.ShapeDtypeStruct((Mp, C), x.dtype),
        grid=(Mp // tm,),
        in_specs=[spec] * 4,
        out_specs=spec,
        compiler_params=pltpu.CompilerParams(
            dimension_semantics=("parallel",)),
    )(*corners)
    out = out[:M] if Mp != M else out
    return out.reshape(B, Hp, Wp, C)


def _fc_stack_kernel(x_ref, w1_ref, b1_ref, w2_ref, b2_ref, w3_ref, b3_ref,
                     o_ref):
    # fc1 -> ReLU -> fc2 -> ReLU -> out, all in one kernel (weights are tiny).
    h = jnp.dot(x_ref[...], w1_ref[...], preferred_element_type=jnp.float32)
    h = jnp.maximum(h + b1_ref[...], 0.0)
    h = jnp.dot(h.astype(jnp.bfloat16), w2_ref[...],
                preferred_element_type=jnp.float32)
    h = jnp.maximum(h + b2_ref[...], 0.0)
    h = jnp.dot(h.astype(jnp.bfloat16), w3_ref[...],
                preferred_element_type=jnp.float32)
    o_ref[...] = h + b3_ref[...]


def fc_stack(x, w1, b1, w2, b2, w3, b3, tmax=1024):
    M, K = x.shape
    Np = w1.shape[1]
    tm, Mp = _choose_m_tile(M, tmax)
    if Mp != M:
        x = jnp.pad(x, ((0, Mp - M), (0, 0)))

    def full_spec(a):
        return pl.BlockSpec(a.shape, lambda i: (0, 0))

    out = pl.pallas_call(
        _fc_stack_kernel,
        out_shape=jax.ShapeDtypeStruct((Mp, Np), jnp.float32),
        grid=(Mp // tm,),
        in_specs=[pl.BlockSpec((tm, K), lambda i: (i, 0)),
                  full_spec(w1), full_spec(b1),
                  full_spec(w2), full_spec(b2),
                  full_spec(w3), full_spec(b3)],
        out_specs=pl.BlockSpec((tm, Np), lambda i: (i, 0)),
        compiler_params=pltpu.CompilerParams(
            dimension_semantics=("parallel",)),
    )(x.astype(jnp.bfloat16), w1, b1, w2, b2, w3, b3)
    return out[:M] if Mp != M else out


# ---------------------------------------------------------------------------
# Conv via channels-last im2col + Pallas matmul
# ---------------------------------------------------------------------------
def conv2d_relu_nhwc(x, wk, b2d, kh, kw):
    """Valid conv + bias + ReLU on channels-last x via im2col matmul."""
    B, H, W, Cin = x.shape
    Ho, Wo = H - kh + 1, W - kw + 1
    # K-order is (kh, kw, Cin), matching the pre-transposed weight wk.
    # TODO(synk): fold im2col into the matmul kernel (k-loop over shifted
    # windows via index_map offsets) to avoid the kh*kw x HBM inflation of the
    # materialized patches array.
    cols = [x[:, i:i + Ho, j:j + Wo, :] for i in range(kh) for j in range(kw)]
    patches = jnp.stack(cols, axis=3).reshape(B * Ho * Wo, kh * kw * Cin)
    y = matmul_bias_act(patches, wk, b2d, relu=True)   # (B*Ho*Wo, 128)
    return y.reshape(B, Ho, Wo, wk.shape[1])           # channels-last


# ---------------------------------------------------------------------------
# Model
# ---------------------------------------------------------------------------
def init_params(key):
    """PyTorch-layout parameters with the usual uniform(-1/sqrt(fan_in)) init."""
    def uniform(k, shape, fan_in):
        bound = 1.0 / jnp.sqrt(float(fan_in))
        return jax.random.uniform(k, shape, jnp.float32, -bound, bound)

    ks = jax.random.split(key, 10)
    return {
        "conv1_w": uniform(ks[0], (CONV1_C, 1, 5, 5), 1 * 5 * 5),
        "conv1_b": uniform(ks[1], (CONV1_C,), 1 * 5 * 5),
        "conv2_w": uniform(ks[2], (CONV2_C, CONV1_C, 5, 5), CONV1_C * 5 * 5),
        "conv2_b": uniform(ks[3], (CONV2_C,), CONV1_C * 5 * 5),
        "fc1_w": uniform(ks[4], (FC_HID, CONV2_C * 4 * 4), CONV2_C * 4 * 4),
        "fc1_b": uniform(ks[5], (FC_HID,), CONV2_C * 4 * 4),
        "fc2_w": uniform(ks[6], (FC_HID, FC_HID), FC_HID),
        "fc2_b": uniform(ks[7], (FC_HID,), FC_HID),
        "out_w": uniform(ks[8], (N_CLASSES, FC_HID), FC_HID),
        "out_b": uniform(ks[9], (N_CLASSES,), FC_HID),
    }


def prepare_params(p):
    """One-time conversion of PyTorch-layout params into kernel layouts:
    pre-transposed, zero-padded to 128 output lanes, weights pre-cast to bf16."""
    def pad_last(a, n=LANES):
        return jnp.pad(a, [(0, 0)] * (a.ndim - 1) + [(0, n - a.shape[-1])])

    def conv_wk(w):  # (Cout, Cin, kh, kw) -> (kh*kw*Cin, 128) bf16
        cout, cin, kh, kw = w.shape
        wk = w.transpose(2, 3, 1, 0).reshape(kh * kw * cin, cout)
        return pad_last(wk).astype(jnp.bfloat16)

    def fc_wk(w, kpad=None):  # (N, K) -> (K or kpad, 128) bf16
        wt = w.T
        if kpad is not None:
            wt = jnp.pad(wt, ((0, kpad - wt.shape[0]), (0, 0)))
        return pad_last(wt).astype(jnp.bfloat16)

    def bias(b):
        return pad_last(b.reshape(1, -1)).astype(jnp.float32)

    # Re-order fc1 columns from PyTorch's NCHW flatten to the channels-last
    # (H, W, C) flatten used by this implementation.
    fc1 = (p["fc1_w"].reshape(FC_HID, CONV2_C, 4, 4)
           .transpose(0, 2, 3, 1).reshape(FC_HID, CONV2_C * 4 * 4))
    return {
        "conv1_wk": conv_wk(p["conv1_w"]), "conv1_b": bias(p["conv1_b"]),
        "conv2_wk": conv_wk(p["conv2_w"]), "conv2_b": bias(p["conv2_b"]),
        "fc1_wk": fc_wk(fc1), "fc1_b": bias(p["fc1_b"]),
        "fc2_wk": fc_wk(p["fc2_w"], kpad=LANES), "fc2_b": bias(p["fc2_b"]),
        "out_wk": fc_wk(p["out_w"], kpad=LANES), "out_b": bias(p["out_b"]),
    }


@jax.jit
def convnet_forward(prep, x):
    """x: (B, 1, 28, 28) NCHW float32 -> logits (B, 10)."""
    xh = jnp.transpose(x, (0, 2, 3, 1))                               # NHWC
    xh = conv2d_relu_nhwc(xh, prep["conv1_wk"], prep["conv1_b"], 5, 5)  # (B,24,24,128)
    xh = max_pool2x2_nhwc(xh)[..., :CONV1_C]                            # (B,12,12,40)
    xh = conv2d_relu_nhwc(xh, prep["conv2_wk"], prep["conv2_b"], 5, 5)  # (B,8,8,128)
    xh = max_pool2x2_nhwc(xh)[..., :CONV2_C]                            # (B,4,4,40)
    B = xh.shape[0]
    xf = xh.reshape(B, -1)                                              # (B, 640)
    logits = fc_stack(xf, prep["fc1_wk"], prep["fc1_b"],
                      prep["fc2_wk"], prep["fc2_b"],
                      prep["out_wk"], prep["out_b"])                    # (B, 128)
    return logits[:, :N_CLASSES]


if __name__ == "__main__":
    key = jax.random.PRNGKey(0)
    pkey, xkey = jax.random.split(key)
    params = init_params(pkey)
    prep = prepare_params(params)
    # Architecture implies 1x28x28 inputs (fc1 expects 40*4*4 features).
    x = jax.random.normal(xkey, (2, 1, 28, 28), jnp.float32)
    out = convnet_forward(prep, x)
    jax.block_until_ready(out)
    assert out.shape == (2, 10), out.shape
    assert bool(jnp.all(jnp.isfinite(out)))
    print("KERNEL_OK")
</pallas_src>

<mosaic_0001>
module attributes {stable_mosaic.version = 11 : i64} {
  func.func @_matmul_bias_act_kernel(%arg0: i32, %arg1: memref<576x25xbf16, #tpu.memory_space<vmem>>, %arg2: memref<25x128xbf16, #tpu.memory_space<vmem>>, %arg3: memref<1x128xf32, #tpu.memory_space<vmem>>, %arg4: memref<576x128xf32, #tpu.memory_space<vmem>>) attributes {dimension_semantics = [#tpu.dimension_semantics<parallel>], iteration_bounds = array<i64: 2>, scalar_prefetch = 0 : i64, scratch_operands = 0 : i64, tpu.core_type = #tpu.core_type<tc>, window_params = [{transform_indices = @transform_0, window_bounds = array<i64: 576, 25>}, {pipeline_mode = #tpu.pipeline_mode<synchronous>, transform_indices = @transform_1, window_bounds = array<i64: 25, 128>}, {pipeline_mode = #tpu.pipeline_mode<synchronous>, transform_indices = @transform_2, window_bounds = array<i64: 1, 128>}, {transform_indices = @transform_3, window_bounds = array<i64: 576, 128>}]} {
    %c0 = arith.constant 0 : index
    %c0_0 = arith.constant 0 : index
    %0 = vector.load %arg1[%c0, %c0_0] : memref<576x25xbf16, #tpu.memory_space<vmem>>, vector<576x25xbf16>
    %c0_1 = arith.constant 0 : index
    %c0_2 = arith.constant 0 : index
    %1 = vector.load %arg2[%c0_1, %c0_2] : memref<25x128xbf16, #tpu.memory_space<vmem>>, vector<25x128xbf16>
    %cst = arith.constant dense<0.000000e+00> : vector<576x128xf32>
    %2 = tpu.matmul %0, %1, %cst {dimension_numbers = #tpu.dot_dimension_numbers<[1], [0], [0], [1], [0, 0, 1, 1], [], []>} : vector<576x25xbf16>, vector<25x128xbf16>, vector<576x128xf32> -> vector<576x128xf32>
    %c0_3 = arith.constant 0 : index
    %c0_4 = arith.constant 0 : index
    %3 = vector.load %arg3[%c0_3, %c0_4] : memref<1x128xf32, #tpu.memory_space<vmem>>, vector<1x128xf32>
    %4 = vector.broadcast %3 : vector<1x128xf32> to vector<576x128xf32>
    %5 = arith.addf %2, %4 : vector<576x128xf32>
    %cst_5 = arith.constant 0.000000e+00 : f32
    %6 = vector.broadcast %cst_5 : f32 to vector<576x128xf32>
    %7 = arith.maximumf %5, %6 : vector<576x128xf32>
    %c0_6 = arith.constant 0 : index
    %c0_7 = arith.constant 0 : index
    %8 = vector.load %arg4[%c0_6, %c0_7] : memref<576x128xf32, #tpu.memory_space<vmem>>, vector<576x128xf32>
    tpu.vector_store %arg4[%c0_6, %c0_7], %7 {strides = array<i32>} : memref<576x128xf32, #tpu.memory_space<vmem>>, vector<576x128xf32>,
    return
  }
  func.func @transform_0(%arg0: i32) -> (i32, i32) {
    %c0_i32 = arith.constant 0 : i32
    %c0_i32_0 = arith.constant 0 : i32
    return %arg0, %c0_i32 : i32, i32
  }
  func.func @transform_1(%arg0: i32) -> (i32, i32) {
    %c0_i32 = arith.constant 0 : i32
    %c0_i32_0 = arith.constant 0 : i32
    %c0_i32_1 = arith.constant 0 : i32
    return %c0_i32, %c0_i32_0 : i32, i32
  }
  func.func @transform_2(%arg0: i32) -> (i32, i32) {
    %c0_i32 = arith.constant 0 : i32
    %c0_i32_0 = arith.constant 0 : i32
    %c0_i32_1 = arith.constant 0 : i32
    return %c0_i32, %c0_i32_0 : i32, i32
  }
  func.func @transform_3(%arg0: i32) -> (i32, i32) {
    %c0_i32 = arith.constant 0 : i32
    %c0_i32_0 = arith.constant 0 : i32
    return %arg0, %c0_i32 : i32, i32
  }
}

module attributes {stable_mosaic.version = 11 : i64} {
  func.func @_maxpool4_kernel(%arg0: i32, %arg1: memref<288x128xf32, #tpu.memory_space<vmem>>, %arg2: memref<288x128xf32, #tpu.memory_space<vmem>>, %arg3: memref<288x128xf32, #tpu.memory_space<vmem>>, %arg4: memref<288x128xf32, #tpu.memory_space<vmem>>, %arg5: memref<288x128xf32, #tpu.memory_space<vmem>>) attributes {dimension_semantics = [#tpu.dimension_semantics<parallel>], iteration_bounds = array<i64: 1>, scalar_prefetch = 0 : i64, scratch_operands = 0 : i64, tpu.core_type = #tpu.core_type<tc>, window_params = [{transform_indices = @transform_0, window_bounds = array<i64: 288, 128>}, {transform_indices = @transform_1, window_bounds = array<i64: 288, 128>}, {transform_indices = @transform_2, window_bounds = array<i64: 288, 128>}, {transform_indices = @transform_3, window_bounds = array<i64: 288, 128>}, {transform_indices = @transform_4, window_bounds = array<i64: 288, 128>}]} {
    %c0 = arith.constant 0 : index
    %c0_0 = arith.constant 0 : index
    %0 = vector.load %arg1[%c0, %c0_0] : memref<288x128xf32, #tpu.memory_space<vmem>>, vector<288x128xf32>
    %c0_1 = arith.constant 0 : index
    %c0_2 = arith.constant 0 : index
    %1 = vector.load %arg2[%c0_1, %c0_2] : memref<288x128xf32, #tpu.memory_space<vmem>>, vector<288x128xf32>
    %2 = arith.maximumf %0, %1 : vector<288x128xf32>
    %c0_3 = arith.constant 0 : index
    %c0_4 = arith.constant 0 : index
    %3 = vector.load %arg3[%c0_3, %c0_4] : memref<288x128xf32, #tpu.memory_space<vmem>>, vector<288x128xf32>
    %c0_5 = arith.constant 0 : index
    %c0_6 = arith.constant 0 : index
    %4 = vector.load %arg4[%c0_5, %c0_6] : memref<288x128xf32, #tpu.memory_space<vmem>>, vector<288x128xf32>
    %5 = arith.maximumf %3, %4 : vector<288x128xf32>
    %6 = arith.maximumf %2, %5 : vector<288x128xf32>
    %c0_7 = arith.constant 0 : index
    %c0_8 = arith.constant 0 : index
    %7 = vector.load %arg5[%c0_7, %c0_8] : memref<288x128xf32, #tpu.memory_space<vmem>>, vector<288x128xf32>
    tpu.vector_store %arg5[%c0_7, %c0_8], %6 {strides = array<i32>} : memref<288x128xf32, #tpu.memory_space<vmem>>, vector<288x128xf32>,
    return
  }
  func.func @transform_0(%arg0: i32) -> (i32, i32) {
    %c0_i32 = arith.constant 0 : i32
    %c0_i32_0 = arith.constant 0 : i32
    return %arg0, %c0_i32 : i32, i32
  }
  func.func @transform_1(%arg0: i32) -> (i32, i32) {
    %c0_i32 = arith.constant 0 : i32
    %c0_i32_0 = arith.constant 0 : i32
    return %arg0, %c0_i32 : i32, i32
  }
  func.func @transform_2(%arg0: i32) -> (i32, i32) {
    %c0_i32 = arith.constant 0 : i32
    %c0_i32_0 = arith.constant 0 : i32
    return %arg0, %c0_i32 : i32, i32
  }
  func.func @transform_3(%arg0: i32) -> (i32, i32) {
    %c0_i32 = arith.constant 0 : i32
    %c0_i32_0 = arith.constant 0 : i32
    return %arg0, %c0_i32 : i32, i32
  }
  func.func @transform_4(%arg0: i32) -> (i32, i32) {
    %c0_i32 = arith.constant 0 : i32
    %c0_i32_0 = arith.constant 0 : i32
    return %arg0, %c0_i32 : i32, i32
  }
}

module attributes {stable_mosaic.version = 11 : i64} {
  func.func @_matmul_bias_act_kernel(%arg0: i32, %arg1: memref<128x1000xbf16, #tpu.memory_space<vmem>>, %arg2: memref<1000x128xbf16, #tpu.memory_space<vmem>>, %arg3: memref<1x128xf32, #tpu.memory_space<vmem>>, %arg4: memref<128x128xf32, #tpu.memory_space<vmem>>) attributes {dimension_semantics = [#tpu.dimension_semantics<parallel>], iteration_bounds = array<i64: 1>, scalar_prefetch = 0 : i64, scratch_operands = 0 : i64, tpu.core_type = #tpu.core_type<tc>, window_params = [{transform_indices = @transform_0, window_bounds = array<i64: 128, 1000>}, {pipeline_mode = #tpu.pipeline_mode<synchronous>, transform_indices = @transform_1, window_bounds = array<i64: 1000, 128>}, {pipeline_mode = #tpu.pipeline_mode<synchronous>, transform_indices = @transform_2, window_bounds = array<i64: 1, 128>}, {transform_indices = @transform_3, window_bounds = array<i64: 128, 128>}]} {
    %c0 = arith.constant 0 : index
    %c0_0 = arith.constant 0 : index
    %0 = vector.load %arg1[%c0, %c0_0] : memref<128x1000xbf16, #tpu.memory_space<vmem>>, vector<128x1000xbf16>
    %c0_1 = arith.constant 0 : index
    %c0_2 = arith.constant 0 : index
    %1 = vector.load %arg2[%c0_1, %c0_2] : memref<1000x128xbf16, #tpu.memory_space<vmem>>, vector<1000x128xbf16>
    %cst = arith.constant dense<0.000000e+00> : vector<128x128xf32>
    %2 = tpu.matmul %0, %1, %cst {dimension_numbers = #tpu.dot_dimension_numbers<[1], [0], [0], [1], [0, 0, 1, 1], [], []>} : vector<128x1000xbf16>, vector<1000x128xbf16>, vector<128x128xf32> -> vector<128x128xf32>
    %c0_3 = arith.constant 0 : index
    %c0_4 = arith.constant 0 : index
    %3 = vector.load %arg3[%c0_3, %c0_4] : memref<1x128xf32, #tpu.memory_space<vmem>>, vector<1x128xf32>
    %4 = vector.broadcast %3 : vector<1x128xf32> to vector<128x128xf32>
    %5 = arith.addf %2, %4 : vector<128x128xf32>
    %cst_5 = arith.constant 0.000000e+00 : f32
    %6 = vector.broadcast %cst_5 : f32 to vector<128x128xf32>
    %7 = arith.maximumf %5, %6 : vector<128x128xf32>
    %c0_6 = arith.constant 0 : index
    %c0_7 = arith.constant 0 : index
    %8 = vector.load %arg4[%c0_6, %c0_7] : memref<128x128xf32, #tpu.memory_space<vmem>>, vector<128x128xf32>
    tpu.vector_store %arg4[%c0_6, %c0_7], %7 {strides = array<i32>} : memref<128x128xf32, #tpu.memory_space<vmem>>, vector<128x128xf32>,
    return
  }
  func.func @transform_0(%arg0: i32) -> (i32, i32) {
    %c0_i32 = arith.constant 0 : i32
    %c0_i32_0 = arith.constant 0 : i32
    return %arg0, %c0_i32 : i32, i32
  }
  func.func @transform_1(%arg0: i32) -> (i32, i32) {
    %c0_i32 = arith.constant 0 : i32
    %c0_i32_0 = arith.constant 0 : i32
    %c0_i32_1 = arith.constant 0 : i32
    return %c0_i32, %c0_i32_0 : i32, i32
  }
  func.func @transform_2(%arg0: i32) -> (i32, i32) {
    %c0_i32 = arith.constant 0 : i32
    %c0_i32_0 = arith.constant 0 : i32
    %c0_i32_1 = arith.constant 0 : i32
    return %c0_i32, %c0_i32_0 : i32, i32
  }
  func.func @transform_3(%arg0: i32) -> (i32, i32) {
    %c0_i32 = arith.constant 0 : i32
    %c0_i32_0 = arith.constant 0 : i32
    return %arg0, %c0_i32 : i32, i32
  }
}

module attributes {stable_mosaic.version = 11 : i64} {
  func.func @_maxpool4_kernel(%arg0: i32, %arg1: memref<32x128xf32, #tpu.memory_space<vmem>>, %arg2: memref<32x128xf32, #tpu.memory_space<vmem>>, %arg3: memref<32x128xf32, #tpu.memory_space<vmem>>, %arg4: memref<32x128xf32, #tpu.memory_space<vmem>>, %arg5: memref<32x128xf32, #tpu.memory_space<vmem>>) attributes {dimension_semantics = [#tpu.dimension_semantics<parallel>], iteration_bounds = array<i64: 1>, scalar_prefetch = 0 : i64, scratch_operands = 0 : i64, tpu.core_type = #tpu.core_type<tc>, window_params = [{transform_indices = @transform_0, window_bounds = array<i64: 32, 128>}, {transform_indices = @transform_1, window_bounds = array<i64: 32, 128>}, {transform_indices = @transform_2, window_bounds = array<i64: 32, 128>}, {transform_indices = @transform_3, window_bounds = array<i64: 32, 128>}, {transform_indices = @transform_4, window_bounds = array<i64: 32, 128>}]} {
    %c0 = arith.constant 0 : index
    %c0_0 = arith.constant 0 : index
    %0 = vector.load %arg1[%c0, %c0_0] : memref<32x128xf32, #tpu.memory_space<vmem>>, vector<32x128xf32>
    %c0_1 = arith.constant 0 : index
    %c0_2 = arith.constant 0 : index
    %1 = vector.load %arg2[%c0_1, %c0_2] : memref<32x128xf32, #tpu.memory_space<vmem>>, vector<32x128xf32>
    %2 = arith.maximumf %0, %1 : vector<32x128xf32>
    %c0_3 = arith.constant 0 : index
    %c0_4 = arith.constant 0 : index
    %3 = vector.load %arg3[%c0_3, %c0_4] : memref<32x128xf32, #tpu.memory_space<vmem>>, vector<32x128xf32>
    %c0_5 = arith.constant 0 : index
    %c0_6 = arith.constant 0 : index
    %4 = vector.load %arg4[%c0_5, %c0_6] : memref<32x128xf32, #tpu.memory_space<vmem>>, vector<32x128xf32>
    %5 = arith.maximumf %3, %4 : vector<32x128xf32>
    %6 = arith.maximumf %2, %5 : vector<32x128xf32>
    %c0_7 = arith.constant 0 : index
    %c0_8 = arith.constant 0 : index
    %7 = vector.load %arg5[%c0_7, %c0_8] : memref<32x128xf32, #tpu.memory_space<vmem>>, vector<32x128xf32>
    tpu.vector_store %arg5[%c0_7, %c0_8], %6 {strides = array<i32>} : memref<32x128xf32, #tpu.memory_space<vmem>>, vector<32x128xf32>,
    return
  }
  func.func @transform_0(%arg0: i32) -> (i32, i32) {
    %c0_i32 = arith.constant 0 : i32
    %c0_i32_0 = arith.constant 0 : i32
    return %arg0, %c0_i32 : i32, i32
  }
  func.func @transform_1(%arg0: i32) -> (i32, i32) {
    %c0_i32 = arith.constant 0 : i32
    %c0_i32_0 = arith.constant 0 : i32
    return %arg0, %c0_i32 : i32, i32
  }
  func.func @transform_2(%arg0: i32) -> (i32, i32) {
    %c0_i32 = arith.constant 0 : i32
    %c0_i32_0 = arith.constant 0 : i32
    return %arg0, %c0_i32 : i32, i32
  }
  func.func @transform_3(%arg0: i32) -> (i32, i32) {
    %c0_i32 = arith.constant 0 : i32
    %c0_i32_0 = arith.constant 0 : i32
    return %arg0, %c0_i32 : i32, i32
  }
  func.func @transform_4(%arg0: i32) -> (i32, i32) {
    %c0_i32 = arith.constant 0 : i32
    %c0_i32_0 = arith.constant 0 : i32
    return %arg0, %c0_i32 : i32, i32
  }
}

module attributes {stable_mosaic.version = 11 : i64} {
  func.func @_fc_stack_kernel(%arg0: i32, %arg1: memref<8x640xbf16, #tpu.memory_space<vmem>>, %arg2: memref<640x128xbf16, #tpu.memory_space<vmem>>, %arg3: memref<1x128xf32, #tpu.memory_space<vmem>>, %arg4: memref<128x128xbf16, #tpu.memory_space<vmem>>, %arg5: memref<1x128xf32, #tpu.memory_space<vmem>>, %arg6: memref<128x128xbf16, #tpu.memory_space<vmem>>, %arg7: memref<1x128xf32, #tpu.memory_space<vmem>>, %arg8: memref<8x128xf32, #tpu.memory_space<vmem>>) attributes {dimension_semantics = [#tpu.dimension_semantics<parallel>], iteration_bounds = array<i64: 1>, scalar_prefetch = 0 : i64, scratch_operands = 0 : i64, tpu.core_type = #tpu.core_type<tc>, window_params = [{transform_indices = @transform_0, window_bounds = array<i64: 8, 640>}, {pipeline_mode = #tpu.pipeline_mode<synchronous>, transform_indices = @transform_1, window_bounds = array<i64: 640, 128>}, {pipeline_mode = #tpu.pipeline_mode<synchronous>, transform_indices = @transform_2, window_bounds = array<i64: 1, 128>}, {pipeline_mode = #tpu.pipeline_mode<synchronous>, transform_indices = @transform_3, window_bounds = array<i64: 128, 128>}, {pipeline_mode = #tpu.pipeline_mode<synchronous>, transform_indices = @transform_4, window_bounds = array<i64: 1, 128>}, {pipeline_mode = #tpu.pipeline_mode<synchronous>, transform_indices = @transform_5, window_bounds = array<i64: 128, 128>}, {pipeline_mode = #tpu.pipeline_mode<synchronous>, transform_indices = @transform_6, window_bounds = array<i64: 1, 128>}, {transform_indices = @transform_7, window_bounds = array<i64: 8, 128>}]} {
    %c0 = arith.constant 0 : index
    %c0_0 = arith.constant 0 : index
    %0 = vector.load %arg1[%c0, %c0_0] : memref<8x640xbf16, #tpu.memory_space<vmem>>, vector<8x640xbf16>
    %c0_1 = arith.constant 0 : index
    %c0_2 = arith.constant 0 : index
    %1 = vector.load %arg2[%c0_1, %c0_2] : memref<640x128xbf16, #tpu.memory_space<vmem>>, vector<640x128xbf16>
    %cst = arith.constant dense<0.000000e+00> : vector<8x128xf32>
    %2 = tpu.matmul %0, %1, %cst {dimension_numbers = #tpu.dot_dimension_numbers<[1], [0], [0], [1], [0, 0, 1, 1], [], []>} : vector<8x640xbf16>, vector<640x128xbf16>, vector<8x128xf32> -> vector<8x128xf32>
    %c0_3 = arith.constant 0 : index
    %c0_4 = arith.constant 0 : index
    %3 = vector.load %arg3[%c0_3, %c0_4] : memref<1x128xf32, #tpu.memory_space<vmem>>, vector<1x128xf32>
    %4 = vector.broadcast %3 : vector<1x128xf32> to vector<8x128xf32>
    %5 = arith.addf %2, %4 : vector<8x128xf32>
    %cst_5 = arith.constant 0.000000e+00 : f32
    %6 = vector.broadcast %cst_5 : f32 to vector<8x128xf32>
    %7 = arith.maximumf %5, %6 : vector<8x128xf32>
    %8 = arith.truncf %7 : vector<8x128xf32> to vector<8x128xbf16>
    %c0_6 = arith.constant 0 : index
    %c0_7 = arith.constant 0 : index
    %9 = vector.load %arg4[%c0_6, %c0_7] : memref<128x128xbf16, #tpu.memory_space<vmem>>, vector<128x128xbf16>
    %cst_8 = arith.constant dense<0.000000e+00> : vector<8x128xf32>
    %10 = tpu.matmul %8, %9, %cst_8 {dimension_numbers = #tpu.dot_dimension_numbers<[1], [0], [0], [1], [0, 0, 1, 1], [], []>} : vector<8x128xbf16>, vector<128x128xbf16>, vector<8x128xf32> -> vector<8x128xf32>
    %c0_9 = arith.constant 0 : index
    %c0_10 = arith.constant 0 : index
    %11 = vector.load %arg5[%c0_9, %c0_10] : memref<1x128xf32, #tpu.memory_space<vmem>>, vector<1x128xf32>
    %12 = vector.broadcast %11 : vector<1x128xf32> to vector<8x128xf32>
    %13 = arith.addf %10, %12 : vector<8x128xf32>
    %cst_11 = arith.constant 0.000000e+00 : f32
    %14 = vector.broadcast %cst_11 : f32 to vector<8x128xf32>
    %15 = arith.maximumf %13, %14 : vector<8x128xf32>
    %16 = arith.truncf %15 : vector<8x128xf32> to vector<8x128xbf16>
    %c0_12 = arith.constant 0 : index
    %c0_13 = arith.constant 0 : index
    %17 = vector.load %arg6[%c0_12, %c0_13] : memref<128x128xbf16, #tpu.memory_space<vmem>>, vector<128x128xbf16>
    %cst_14 = arith.constant dense<0.000000e+00> : vector<8x128xf32>
    %18 = tpu.matmul %16, %17, %cst_14 {dimension_numbers = #tpu.dot_dimension_numbers<[1], [0], [0], [1], [0, 0, 1, 1], [], []>} : vector<8x128xbf16>, vector<128x128xbf16>, vector<8x128xf32> -> vector<8x128xf32>
    %c0_15 = arith.constant 0 : index
    %c0_16 = arith.constant 0 : index
    %19 = vector.load %arg7[%c0_15, %c0_16] : memref<1x128xf32, #tpu.memory_space<vmem>>, vector<1x128xf32>
    %20 = vector.broadcast %19 : vector<1x128xf32> to vector<8x128xf32>
    %21 = arith.addf %18, %20 : vector<8x128xf32>
    %c0_17 = arith.constant 0 : index
    %c0_18 = arith.constant 0 : index
    %22 = vector.load %arg8[%c0_17, %c0_18] : memref<8x128xf32, #tpu.memory_space<vmem>>, vector<8x128xf32>
    tpu.vector_store %arg8[%c0_17, %c0_18], %21 {strides = array<i32>} : memref<8x128xf32, #tpu.memory_space<vmem>>, vector<8x128xf32>,
    return
  }
  func.func @transform_0(%arg0: i32) -> (i32, i32) {
    %c0_i32 = arith.constant 0 : i32
    %c0_i32_0 = arith.constant 0 : i32
    return %arg0, %c0_i32 : i32, i32
  }
  func.func @transform_1(%arg0: i32) -> (i32, i32) {
    %c0_i32 = arith.constant 0 : i32
    %c0_i32_0 = arith.constant 0 : i32
    %c0_i32_1 = arith.constant 0 : i32
    return %c0_i32, %c0_i32_0 : i32, i32
  }
  func.func @transform_2(%arg0: i32) -> (i32, i32) {
    %c0_i32 = arith.constant 0 : i32
    %c0_i32_0 = arith.constant 0 : i32
    %c0_i32_1 = arith.constant 0 : i32
    return %c0_i32, %c0_i32_0 : i32, i32
  }
  func.func @transform_3(%arg0: i32) -> (i32, i32) {
    %c0_i32 = arith.constant 0 : i32
    %c0_i32_0 = arith.constant 0 : i32
    %c0_i32_1 = arith.constant 0 : i32
    return %c0_i32, %c0_i32_0 : i32, i32
  }
  func.func @transform_4(%arg0: i32) -> (i32, i32) {
    %c0_i32 = arith.constant 0 : i32
    %c0_i32_0 = arith.constant 0 : i32
    %c0_i32_1 = arith.constant 0 : i32
    return %c0_i32, %c0_i32_0 : i32, i32
  }
  func.func @transform_5(%arg0: i32) -> (i32, i32) {
    %c0_i32 = arith.constant 0 : i32
    %c0_i32_0 = arith.constant 0 : i32
    %c0_i32_1 = arith.constant 0 : i32
    return %c0_i32, %c0_i32_0 : i32, i32
  }
  func.func @transform_6(%arg0: i32) -> (i32, i32) {
    %c0_i32 = arith.constant 0 : i32
    %c0_i32_0 = arith.constant 0 : i32
    %c0_i32_1 = arith.constant 0 : i32
    return %c0_i32, %c0_i32_0 : i32, i32
  }
  func.func @transform_7(%arg0: i32) -> (i32, i32) {
    %c0_i32 = arith.constant 0 : i32
    %c0_i32_0 = arith.constant 0 : i32
    return %arg0, %c0_i32 : i32, i32
  }
}

</mosaic_0001>

<bundles_post_ra>
// kernel: convnet_forward.5
= control target key start
LH: loop header
LB: loop body
LE: loop exit
PB: predicated region body
PF: predicated region fallthrough
CT: control target
= control target key end

     0   :  { %s1364_s12 = smov 0   ;;  %s1616_s0 = inlined_call_operand.vmem [shape: bf16[1152,25], index: 0, kind: input, shape index: {}]   ;;  %s1617_s1 = inlined_call_operand.vmem [shape: bf16[25,128], index: 1, kind: input, shape index: {}]   ;;  %s1618_s2 = inlined_call_operand.vmem [shape: f32[1,128], index: 2, kind: input, shape index: {}]   ;;  %s1619_s3 = inlined_call_operand.vmem [shape: f32[1152,128], index: 3, kind: output, shape index: {}]  }
   0x1 LB: > { %s1086_s13 = sadd.s32 4294967295, %s1341_s12   ;;  %p1090_p0 = scmp.ge.s32.totalorder %s1341_s12, 1  ;;  %s1341_s12 = sphi %s1364_s12, %s13_s12  }
   0x2   : > { %p138_p1 = scmp.lt.s32.totalorder %s1341_s12, 3 }
   0x4   : > { %p139_p2 = pnand %p1090_p0, %p138_p1 }
   0x5   : > { %v1297_v0 = vld [vmem:[%s1617_s1] sm:$0xff] (!%p139_p2)   ;;  %vm558_vm0 = vcmask (!%p139_p2), 1043456   ;;  %v1298_v1 = vld [vmem:[%s1617_s1 + $0x8] sm:$0x1f] (!%p139_p2)   ;;  %vm559_vm1 = vcmask (!%p139_p2), 1044480   ;;  %s162_s18 = smul.u32 (!%p139_p2), 72, %s1086_s13 }
   0x6   : > { %142 = sbr.rel (%p139_p2) target bundleno = 302 (0x12e), region = 32  ;;  %1208 = vmatprep.subr.bf16.mxu0 (!%p139_p2), %v1297_v0  ;;  %1284 = vmatprep.subr.bf16.mxu1 (!%p139_p2), %v1297_v0  ;;  %v1343_v2 = vmov (!%p139_p2), 65535   ;;  %vm449_vm2 = vcmask (!%p139_p2), 203776   ;;  %v1461_v42 = vld [vmem:[%s1618_s2] ss:$0 sm:$0xff] (!%p139_p2) }
   0x7   : > { %1209 = vmatpush3.bf16.msra.mxu0 (!%p139_p2), %v1297_v0  ;;  %1286 = vmatpush3.bf16.msra.mxu1 (!%p139_p2), %v1297_v0  ;;  %v560_v3 = vsel (!%p139_p2), %vm558_vm0, 4294967295, %v1343_v2  ;;  %p163_p3 = scmp.lt.s32.totalorder (!%p139_p2), %s162_s18, 143 }
   0x8   : > { %v561_v4 = vsel (!%p139_p2), %vm559_vm1, %v560_v3, 0 }
   0x9   : > { %v563_v5 = vand.u32 (!%p139_p2), %v1298_v1, %v561_v4 }
   0xb   : > { %1210 = vmatprep.subr.bf16.mxu0 (!%p139_p2), %v563_v5  ;;  %1285 = vmatprep.subr.bf16.mxu1 (!%p139_p2), %v563_v5 }
   0xc   : > { %1211 = vmatpush3.bf16.msra.mxu0 (!%p139_p2), %v563_v5  ;;  %1287 = vmatpush3.bf16.msra.mxu1 (!%p139_p2), %v563_v5 }
   0xd   : > { %s1621_s18 = smov (!%p163_p3, %s162_s18), 143 }
   0xe   : > { %s1091_s19 = sshll.u32 %s1621_s18, 2  ;;  %s1092_s25 = sshll.u32 %s1621_s18, 3 }
   0xf   : > { %s1384_s22 = scalar_lea.vmem %s1616_s0, %s1091_s19  ;;  %s1468_s28 = scalar_lea.vmem %s1619_s3, %s1092_s25 }
  0x10   : > { %v1299_v6 = vld [vmem:[%s1384_s22] sm:$0xff]   ;;  %v1300_v7 = vld [vmem:[%s1384_s22 + $0x90] sm:$0xff]   ;;  %v1301_v8 = vld [vmem:[%s1384_s22 + $0x8] sm:$0xff]  }
  0x11   : > { %1212 = vmatprep.mubr.msk.bf16.mxu0 %vm449_vm2, %v1299_v6  ;;  %1248 = vmatprep.mubr.msk.bf16.mxu1 %vm449_vm2, %v1300_v7  ;;  %v1302_v9 = vld [vmem:[%s1384_s22 + $0x98] sm:$0xff]   ;;  %v1303_v10 = vld [vmem:[%s1384_s22 + $0x10] sm:$0xff]   ;;  %v1304_v11 = vld [vmem:[%s1384_s22 + $0xa0] sm:$0xff]  }
  0x12   : > { %1213 = vmatmul.mubr.msk.bf16.vlgmr.msra.gmra.mrb[0].mxu0 %vm449_vm2, %v1301_v8  ;;  %1249 = vmatmul.mubr.msk.bf16.vlgmr.msra.gmra.mrb[0].mxu1 %vm449_vm2, %v1302_v9  ;;  %v1305_v12 = vld [vmem:[%s1384_s22 + $0x18] sm:$0xff]   ;;  %v1306_v13 = vld [vmem:[%s1384_s22 + $0xa8] sm:$0xff]   ;;  %v1307_v14 = vld [vmem:[%s1384_s22 + $0x20] sm:$0xff]  }
  0x13   : > { %1216 = vmatprep.mubr.msk.bf16.mxu0 %vm449_vm2, %v1303_v10  ;;  %1252 = vmatprep.mubr.msk.bf16.mxu1 %vm449_vm2, %v1304_v11  ;;  %v1308_v15 = vld [vmem:[%s1384_s22 + $0xb0] sm:$0xff]   ;;  %v1309_v16 = vld [vmem:[%s1384_s22 + $0x28] sm:$0xff]   ;;  %v1310_v17 = vld [vmem:[%s1384_s22 + $0xb8] sm:$0xff]  }
  0x14   : > { %v1311_v18 = vld [vmem:[%s1384_s22 + $0x30] sm:$0xff]   ;;  %v1312_v19 = vld [vmem:[%s1384_s22 + $0xc0] sm:$0xff]   ;;  %v1313_v20 = vld [vmem:[%s1384_s22 + $0x38] sm:$0xff]  }
  0x15   : > { %v1314_v21 = vld [vmem:[%s1384_s22 + $0xc8] sm:$0xff]   ;;  %v1315_v22 = vld [vmem:[%s1384_s22 + $0x40] sm:$0xff]   ;;  %v1316_v23 = vld [vmem:[%s1384_s22 + $0xd0] sm:$0xff]  }
  0x16   : > { %v1317_v24 = vld [vmem:[%s1384_s22 + $0x48] sm:$0xff]   ;;  %v1318_v25 = vld [vmem:[%s1384_s22 + $0xd8] sm:$0xff]   ;;  %v1319_v26 = vld [vmem:[%s1384_s22 + $0x50] sm:$0xff]  }
  0x17   : > { %v1320_v27 = vld [vmem:[%s1384_s22 + $0xe0] sm:$0xff]   ;;  %v1321_v28 = vld [vmem:[%s1384_s22 + $0x58] sm:$0xff]   ;;  %v1322_v29 = vld [vmem:[%s1384_s22 + $0xe8] sm:$0xff]  }
  0x18   : > { %v1323_v30 = vld [vmem:[%s1384_s22 + $0x60] sm:$0xff]   ;;  %v1324_v31 = vld [vmem:[%s1384_s22 + $0xf0] sm:$0xff]   ;;  %v1325_v32 = vld [vmem:[%s1384_s22 + $0x68] sm:$0xff]  }
  0x19   : > { %v1326_v33 = vld [vmem:[%s1384_s22 + $0xf8] sm:$0xff]   ;;  %v1327_v34 = vld [vmem:[%s1384_s22 + $0x70] sm:$0xff]   ;;  %v1328_v35 = vld [vmem:[%s1384_s22 + $0x100] sm:$0xff]  }
  0x1a   : > { %1217 = vmatmul.mubr.msk.bf16.gmra.mrb[4].mxu0 %vm449_vm2, %v1305_v12  ;;  %1253 = vmatmul.mubr.msk.bf16.gmra.mrb[4].mxu1 %vm449_vm2, %v1306_v13  ;;  %v1329_v36 = vld [vmem:[%s1384_s22 + $0x78] sm:$0xff]   ;;  %v1330_v37 = vld [vmem:[%s1384_s22 + $0x108] sm:$0xff]   ;;  %v1331_v38 = vld [vmem:[%s1384_s22 + $0x80] sm:$0xff]  }
  0x1b   : > { %1220 = vmatprep.mubr.msk.bf16.mxu0 %vm449_vm2, %v1307_v14  ;;  %1256 = vmatprep.mubr.msk.bf16.mxu1 %vm449_vm2, %v1308_v15  ;;  %v1332_v39 = vld [vmem:[%s1384_s22 + $0x110] sm:$0xff]   ;;  %v1333_v40 = vld [vmem:[%s1384_s22 + $0x88] sm:$0xff]   ;;  %v1334_v41 = vld [vmem:[%s1384_s22 + $0x118] sm:$0xff]  }
  0x22   : > { %1221 = vmatmul.mubr.msk.bf16.gmra.mrb[8].mxu0 %vm449_vm2, %v1309_v16  ;;  %1257 = vmatmul.mubr.msk.bf16.gmra.mrb[8].mxu1 %vm449_vm2, %v1310_v17 }
  0x23   : > { %1224 = vmatprep.mubr.msk.bf16.mxu0 %vm449_vm2, %v1311_v18  ;;  %1260 = vmatprep.mubr.msk.bf16.mxu1 %vm449_vm2, %v1312_v19 }
  0x2a   : > { %1225 = vmatmul.mubr.msk.bf16.gmra.mrb[12].mxu0 %vm449_vm2, %v1313_v20  ;;  %1261 = vmatmul.mubr.msk.bf16.gmra.mrb[12].mxu1 %vm449_vm2, %v1314_v21 }
  0x2b   : > { %1228 = vmatprep.mubr.msk.bf16.mxu0 %vm449_vm2, %v1315_v22  ;;  %1264 = vmatprep.mubr.msk.bf16.mxu1 %vm449_vm2, %v1316_v23 }
  0x32   : > { %1229 = vmatmul.mubr.msk.bf16.gmra.mrb[16].mxu0 %vm449_vm2, %v1317_v24  ;;  %1265 = vmatmul.mubr.msk.bf16.gmra.mrb[16].mxu1 %vm449_vm2, %v1318_v25 }
  0x33   : > { %1232 = vmatprep.mubr.msk.bf16.mxu0 %vm449_vm2, %v1319_v26  ;;  %1268 = vmatprep.mubr.msk.bf16.mxu1 %vm449_vm2, %v1320_v27 }
  0x3a   : > { %1233 = vmatmul.mubr.msk.bf16.gmra.mrb[20].mxu0 %vm449_vm2, %v1321_v28  ;;  %1269 = vmatmul.mubr.msk.bf16.gmra.mrb[20].mxu1 %vm449_vm2, %v1322_v29 }
  0x3b   : > { %1236 = vmatprep.mubr.msk.bf16.mxu0 %vm449_vm2, %v1323_v30  ;;  %1272 = vmatprep.mubr.msk.bf16.mxu1 %vm449_vm2, %v1324_v31 }
  0x42   : > { %1237 = vmatmul.mubr.msk.bf16.gmra.mrb[24].mxu0 %vm449_vm2, %v1325_v32  ;;  %1273 = vmatmul.mubr.msk.bf16.gmra.mrb[24].mxu1 %vm449_vm2, %v1326_v33 }
  0x43   : > { %1240 = vmatprep.mubr.msk.bf16.mxu0 %vm449_vm2, %v1327_v34  ;;  %1276 = vmatprep.mubr.msk.bf16.mxu1 %vm449_vm2, %v1328_v35 }
  0x4a   : > { %1241 = vmatmul.mubr.msk.bf16.gmra.mrb[28].mxu0 %vm449_vm2, %v1329_v36  ;;  %1277 = vmatmul.mubr.msk.bf16.gmra.mrb[28].mxu1 %vm449_vm2, %v1330_v37 }
  0x4b   : > { %1244 = vmatprep.mubr.msk.bf16.mxu0 %vm449_vm2, %v1331_v38  ;;  %1280 = vmatprep.mubr.msk.bf16.mxu1 %vm449_vm2, %v1332_v39 }
  0x52   : > { %1245 = vmatmul.mubr.msk.bf16.gmra.mrb[32].mxu0 %vm449_vm2, %v1333_v40  ;;  %1281 = vmatmul.mubr.msk.bf16.gmra.mrb[32].mxu1 %vm449_vm2, %v1334_v41 }
  0xe5   : > { %v1214_v43 = vpop.f32.mrb[0].mxu0  ;;  %v1250_v45 = vpop.f32.mrb[0].mxu1 }
  0xe6   : > { %v608_v44 = vadd.f32 %v1214_v43, %v1461_v42  ;;  %v599_v46 = vpop.f32.mrb[1].mxu0  ;;  %v752_v47 = vadd.f32 %v1250_v45, %v1461_v42  ;;  %v743_v49 = vpop.f32.mrb[1].mxu1 }
  0xe7   : > { %v600_v48 = vadd.f32 %v1461_v42, %v599_v46  ;;  %v1215_v50 = vpop.f32.mrb[2].mxu0  ;;  %v744_v52 = vadd.f32 %v1461_v42, %v743_v49  ;;  %v1251_v54 = vpop.f32.mrb[2].mxu1 }
  0xe8   : > { %v888_v51 = vmax.f32 %v608_v44, 0.0  ;;  %v611_v53 = vadd.f32 %v1215_v50, %v1461_v42  ;;  %v602_v55 = vpop.f32.mrb[3].mxu0  ;;  %v924_v56 = vmax.f32 %v752_v47, 0.0  ;;  %v755_v58 = vadd.f32 %v1251_v54, %v1461_v42  ;;  %v746_v60 = vpop.f32.mrb[3].mxu1 }
  0xe9   : > { %v886_v57 = vmax.f32 %v600_v48, 0.0  ;;  %v603_v59 = vadd.f32 %v1461_v42, %v602_v55  ;;  %v922_v61 = vmax.f32 %v744_v52, 0.0  ;;  %v747_v63 = vadd.f32 %v1461_v42, %v746_v60 }
  0xea   : > { %960 = vst [vmem:[%s1468_s28 + $0x10] sm:$0xff] %v888_v51  ;;  %v889_v62 = vmax.f32 %v611_v53, 0.0  ;;  %996 = vst [vmem:[%s1468_s28 + $0x130] sm:$0xff] %v924_v56  ;;  %v925_v0 = vmax.f32 %v755_v58, 0.0 }
  0xeb   : > { %958 = vst [vmem:[%s1468_s28] sm:$0xff] %v886_v57  ;;  %v887_v1 = vmax.f32 %v603_v59, 0.0  ;;  %994 = vst [vmem:[%s1468_s28 + $0x120] sm:$0xff] %v922_v61  ;;  %v923_v2 = vmax.f32 %v747_v63, 0.0 }
  0xec   : > { %961 = vst [vmem:[%s1468_s28 + $0x18] sm:$0xff] %v889_v62  ;;  %997 = vst [vmem:[%s1468_s28 + $0x138] sm:$0xff] %v925_v0 }
  0xed   : > { %959 = vst [vmem:[%s1468_s28 + $0x8] sm:$0xff] %v887_v1  ;;  %v1218_v3 = vpop.f32.mrb[4].mxu0  ;;  %995 = vst [vmem:[%s1468_s28 + $0x128] sm:$0xff] %v923_v2  ;;  %v1254_v5 = vpop.f32.mrb[4].mxu1 }
  0xee   : > { %v624_v4 = vadd.f32 %v1218_v3, %v1461_v42  ;;  %v615_v6 = vpop.f32.mrb[5].mxu0  ;;  %v768_v7 = vadd.f32 %v1254_v5, %v1461_v42  ;;  %v759_v9 = vpop.f32.mrb[5].mxu1 }
  0xef   : > { %v616_v8 = vadd.f32 %v1461_v42, %v615_v6  ;;  %v1219_v10 = vpop.f32.mrb[6].mxu0  ;;  %v760_v12 = vadd.f32 %v1461_v42, %v759_v9  ;;  %v1255_v14 = vpop.f32.mrb[6].mxu1 }
  0xf0   : > { %v892_v11 = vmax.f32 %v624_v4, 0.0  ;;  %v627_v13 = vadd.f32 %v1219_v10, %v1461_v42  ;;  %v618_v15 = vpop.f32.mrb[7].mxu0  ;;  %v928_v16 = vmax.f32 %v768_v7, 0.0  ;;  %v771_v18 = vadd.f32 %v1255_v14, %v1461_v42  ;;  %v762_v20 = vpop.f32.mrb[7].mxu1 }
  0xf1   : > { %v890_v17 = vmax.f32 %v616_v8, 0.0  ;;  %v619_v19 = vadd.f32 %v1461_v42, %v618_v15  ;;  %v926_v21 = vmax.f32 %v760_v12, 0.0  ;;  %v763_v23 = vadd.f32 %v1461_v42, %v762_v20 }
  0xf2   : > { %964 = vst [vmem:[%s1468_s28 + $0x30] sm:$0xff] %v892_v11  ;;  %v893_v22 = vmax.f32 %v627_v13, 0.0  ;;  %1000 = vst [vmem:[%s1468_s28 + $0x150] sm:$0xff] %v928_v16  ;;  %v929_v24 = vmax.f32 %v771_v18, 0.0 }
  0xf3   : > { %962 = vst [vmem:[%s1468_s28 + $0x20] sm:$0xff] %v890_v17  ;;  %v891_v25 = vmax.f32 %v619_v19, 0.0  ;;  %998 = vst [vmem:[%s1468_s28 + $0x140] sm:$0xff] %v926_v21  ;;  %v927_v26 = vmax.f32 %v763_v23, 0.0 }
  0xf4   : > { %965 = vst [vmem:[%s1468_s28 + $0x38] sm:$0xff] %v893_v22  ;;  %1001 = vst [vmem:[%s1468_s28 + $0x158] sm:$0xff] %v929_v24 }
  0xf5   : > { %963 = vst [vmem:[%s1468_s28 + $0x28] sm:$0xff] %v891_v25  ;;  %v1222_v27 = vpop.f32.mrb[8].mxu0  ;;  %999 = vst [vmem:[%s1468_s28 + $0x148] sm:$0xff] %v927_v26  ;;  %v1258_v29 = vpop.f32.mrb[8].mxu1 }
  0xf6   : > { %v640_v28 = vadd.f32 %v1222_v27, %v1461_v42  ;;  %v631_v30 = vpop.f32.mrb[9].mxu0  ;;  %v784_v31 = vadd.f32 %v1258_v29, %v1461_v42  ;;  %v775_v33 = vpop.f32.mrb[9].mxu1 }
  0xf7   : > { %v632_v32 = vadd.f32 %v1461_v42, %v631_v30  ;;  %v1223_v34 = vpop.f32.mrb[10].mxu0  ;;  %v776_v36 = vadd.f32 %v1461_v42, %v775_v33  ;;  %v1259_v38 = vpop.f32.mrb[10].mxu1 }
  0xf8   : > { %v896_v35 = vmax.f32 %v640_v28, 0.0  ;;  %v643_v37 = vadd.f32 %v1223_v34, %v1461_v42  ;;  %v634_v39 = vpop.f32.mrb[11].mxu0  ;;  %v932_v40 = vmax.f32 %v784_v31, 0.0  ;;  %v787_v43 = vadd.f32 %v1259_v38, %v1461_v42  ;;  %v778_v45 = vpop.f32.mrb[11].mxu1 }
  0xf9   : > { %v894_v41 = vmax.f32 %v632_v32, 0.0  ;;  %v635_v44 = vadd.f32 %v1461_v42, %v634_v39  ;;  %v930_v46 = vmax.f32 %v776_v36, 0.0  ;;  %v779_v48 = vadd.f32 %v1461_v42, %v778_v45 }
  0xfa   : > { %968 = vst [vmem:[%s1468_s28 + $0x50] sm:$0xff] %v896_v35  ;;  %v897_v47 = vmax.f32 %v643_v37, 0.0  ;;  %1004 = vst [vmem:[%s1468_s28 + $0x170] sm:$0xff] %v932_v40  ;;  %v933_v49 = vmax.f32 %v787_v43, 0.0 }
  0xfb   : > { %966 = vst [vmem:[%s1468_s28 + $0x40] sm:$0xff] %v894_v41  ;;  %v895_v50 = vmax.f32 %v635_v44, 0.0  ;;  %1002 = vst [vmem:[%s1468_s28 + $0x160] sm:$0xff] %v930_v46  ;;  %v931_v51 = vmax.f32 %v779_v48, 0.0 }
  0xfc   : > { %969 = vst [vmem:[%s1468_s28 + $0x58] sm:$0xff] %v897_v47  ;;  %1005 = vst [vmem:[%s1468_s28 + $0x178] sm:$0xff] %v933_v49 }
  0xfd   : > { %967 = vst [vmem:[%s1468_s28 + $0x48] sm:$0xff] %v895_v50  ;;  %v1226_v52 = vpop.f32.mrb[12].mxu0  ;;  %1003 = vst [vmem:[%s1468_s28 + $0x168] sm:$0xff] %v931_v51  ;;  %v1262_v54 = vpop.f32.mrb[12].mxu1 }
  0xfe   : > { %v656_v53 = vadd.f32 %v1226_v52, %v1461_v42  ;;  %v647_v55 = vpop.f32.mrb[13].mxu0  ;;  %v800_v56 = vadd.f32 %v1262_v54, %v1461_v42  ;;  %v791_v58 = vpop.f32.mrb[13].mxu1 }
  0xff   : > { %v648_v57 = vadd.f32 %v1461_v42, %v647_v55  ;;  %v1227_v59 = vpop.f32.mrb[14].mxu0  ;;  %v792_v61 = vadd.f32 %v1461_v42, %v791_v58  ;;  %v1263_v63 = vpop.f32.mrb[14].mxu1 }
 0x100   : > { %v900_v60 = vmax.f32 %v656_v53, 0.0  ;;  %v659_v62 = vadd.f32 %v1227_v59, %v1461_v42  ;;  %v650_v0 = vpop.f32.mrb[15].mxu0  ;;  %v936_v1 = vmax.f32 %v800_v56, 0.0  ;;  %v803_v3 = vadd.f32 %v1263_v63, %v1461_v42  ;;  %v794_v5 = vpop.f32.mrb[15].mxu1 }
 0x101   : > { %v898_v2 = vmax.f32 %v648_v57, 0.0  ;;  %v651_v4 = vadd.f32 %v1461_v42, %v650_v0  ;;  %v934_v6 = vmax.f32 %v792_v61, 0.0  ;;  %v795_v8 = vadd.f32 %v1461_v42, %v794_v5 }
 0x102   : > { %972 = vst [vmem:[%s1468_s28 + $0x70] sm:$0xff] %v900_v60  ;;  %v901_v7 = vmax.f32 %v659_v62, 0.0  ;;  %1008 = vst [vmem:[%s1468_s28 + $0x190] sm:$0xff] %v936_v1  ;;  %v937_v9 = vmax.f32 %v803_v3, 0.0 }
 0x103   : > { %970 = vst [vmem:[%s1468_s28 + $0x60] sm:$0xff] %v898_v2  ;;  %v899_v10 = vmax.f32 %v651_v4, 0.0  ;;  %1006 = vst [vmem:[%s1468_s28 + $0x180] sm:$0xff] %v934_v6  ;;  %v935_v11 = vmax.f32 %v795_v8, 0.0 }
 0x104   : > { %973 = vst [vmem:[%s1468_s28 + $0x78] sm:$0xff] %v901_v7  ;;  %1009 = vst [vmem:[%s1468_s28 + $0x198] sm:$0xff] %v937_v9 }
 0x105   : > { %971 = vst [vmem:[%s1468_s28 + $0x68] sm:$0xff] %v899_v10  ;;  %v1230_v12 = vpop.f32.mrb[16].mxu0  ;;  %1007 = vst [vmem:[%s1468_s28 + $0x188] sm:$0xff] %v935_v11  ;;  %v1266_v14 = vpop.f32.mrb[16].mxu1 }
 0x106   : > { %v672_v13 = vadd.f32 %v1230_v12, %v1461_v42  ;;  %v663_v15 = vpop.f32.mrb[17].mxu0  ;;  %v816_v16 = vadd.f32 %v1266_v14, %v1461_v42  ;;  %v807_v18 = vpop.f32.mrb[17].mxu1 }
 0x107   : > { %v664_v17 = vadd.f32 %v1461_v42, %v663_v15  ;;  %v1231_v19 = vpop.f32.mrb[18].mxu0  ;;  %v808_v21 = vadd.f32 %v1461_v42, %v807_v18  ;;  %v1267_v23 = vpop.f32.mrb[18].mxu1 }
 0x108   : > { %v904_v20 = vmax.f32 %v672_v13, 0.0  ;;  %v675_v22 = vadd.f32 %v1231_v19, %v1461_v42  ;;  %v666_v24 = vpop.f32.mrb[19].mxu0  ;;  %v940_v25 = vmax.f32 %v816_v16, 0.0  ;;  %v819_v27 = vadd.f32 %v1267_v23, %v1461_v42  ;;  %v810_v29 = vpop.f32.mrb[19].mxu1 }
 0x109   : > { %v902_v26 = vmax.f32 %v664_v17, 0.0  ;;  %v667_v28 = vadd.f32 %v1461_v42, %v666_v24  ;;  %v938_v30 = vmax.f32 %v808_v21, 0.0  ;;  %v811_v32 = vadd.f32 %v1461_v42, %v810_v29 }
 0x10a   : > { %976 = vst [vmem:[%s1468_s28 + $0x90] sm:$0xff] %v904_v20  ;;  %v905_v31 = vmax.f32 %v675_v22, 0.0  ;;  %1012 = vst [vmem:[%s1468_s28 + $0x1b0] sm:$0xff] %v940_v25  ;;  %v941_v33 = vmax.f32 %v819_v27, 0.0 }
 0x10b   : > { %974 = vst [vmem:[%s1468_s28 + $0x80] sm:$0xff] %v902_v26  ;;  %v903_v34 = vmax.f32 %v667_v28, 0.0  ;;  %1010 = vst [vmem:[%s1468_s28 + $0x1a0] sm:$0xff] %v938_v30  ;;  %v939_v35 = vmax.f32 %v811_v32, 0.0 }
 0x10c   : > { %977 = vst [vmem:[%s1468_s28 + $0x98] sm:$0xff] %v905_v31  ;;  %1013 = vst [vmem:[%s1468_s28 + $0x1b8] sm:$0xff] %v941_v33 }
 0x10d   : > { %975 = vst [vmem:[%s1468_s28 + $0x88] sm:$0xff] %v903_v34  ;;  %v1234_v36 = vpop.f32.mrb[20].mxu0  ;;  %1011 = vst [vmem:[%s1468_s28 + $0x1a8] sm:$0xff] %v939_v35  ;;  %v1270_v38 = vpop.f32.mrb[20].mxu1 }
 0x10e   : > { %v688_v37 = vadd.f32 %v1234_v36, %v1461_v42  ;;  %v679_v39 = vpop.f32.mrb[21].mxu0  ;;  %v832_v40 = vadd.f32 %v1270_v38, %v1461_v42  ;;  %v823_v43 = vpop.f32.mrb[21].mxu1 }
 0x10f   : > { %v680_v41 = vadd.f32 %v1461_v42, %v679_v39  ;;  %v1235_v44 = vpop.f32.mrb[22].mxu0  ;;  %v824_v46 = vadd.f32 %v1461_v42, %v823_v43  ;;  %v1271_v48 = vpop.f32.mrb[22].mxu1 }
 0x110   : > { %v908_v45 = vmax.f32 %v688_v37, 0.0  ;;  %v691_v47 = vadd.f32 %v1235_v44, %v1461_v42  ;;  %v682_v49 = vpop.f32.mrb[23].mxu0  ;;  %v944_v50 = vmax.f32 %v832_v40, 0.0  ;;  %v835_v52 = vadd.f32 %v1271_v48, %v1461_v42  ;;  %v826_v54 = vpop.f32.mrb[23].mxu1 }
 0x111   : > { %v906_v51 = vmax.f32 %v680_v41, 0.0  ;;  %v683_v53 = vadd.f32 %v1461_v42, %v682_v49  ;;  %v942_v55 = vmax.f32 %v824_v46, 0.0  ;;  %v827_v57 = vadd.f32 %v1461_v42, %v826_v54 }
 0x112   : > { %980 = vst [vmem:[%s1468_s28 + $0xb0] sm:$0xff] %v908_v45  ;;  %v909_v56 = vmax.f32 %v691_v47, 0.0  ;;  %1016 = vst [vmem:[%s1468_s28 + $0x1d0] sm:$0xff] %v944_v50  ;;  %v945_v58 = vmax.f32 %v835_v52, 0.0 }
 0x113   : > { %978 = vst [vmem:[%s1468_s28 + $0xa0] sm:$0xff] %v906_v51  ;;  %v907_v59 = vmax.f32 %v683_v53, 0.0  ;;  %1014 = vst [vmem:[%s1468_s28 + $0x1c0] sm:$0xff] %v942_v55  ;;  %v943_v60 = vmax.f32 %v827_v57, 0.0 }
 0x114   : > { %981 = vst [vmem:[%s1468_s28 + $0xb8] sm:$0xff] %v909_v56  ;;  %1017 = vst [vmem:[%s1468_s28 + $0x1d8] sm:$0xff] %v945_v58 }
 0x115   : > { %979 = vst [vmem:[%s1468_s28 + $0xa8] sm:$0xff] %v907_v59  ;;  %v1238_v61 = vpop.f32.mrb[24].mxu0  ;;  %1015 = vst [vmem:[%s1468_s28 + $0x1c8] sm:$0xff] %v943_v60  ;;  %v1274_v63 = vpop.f32.mrb[24].mxu1 }
 0x116   : > { %v704_v62 = vadd.f32 %v1238_v61, %v1461_v42  ;;  %v695_v0 = vpop.f32.mrb[25].mxu0  ;;  %v848_v1 = vadd.f32 %v1274_v63, %v1461_v42  ;;  %v839_v3 = vpop.f32.mrb[25].mxu1 }
 0x117   : > { %v696_v2 = vadd.f32 %v1461_v42, %v695_v0  ;;  %v1239_v4 = vpop.f32.mrb[26].mxu0  ;;  %v840_v6 = vadd.f32 %v1461_v42, %v839_v3  ;;  %v1275_v8 = vpop.f32.mrb[26].mxu1 }
 0x118   : > { %v912_v5 = vmax.f32 %v704_v62, 0.0  ;;  %v707_v7 = vadd.f32 %v1239_v4, %v1461_v42  ;;  %v698_v9 = vpop.f32.mrb[27].mxu0  ;;  %v948_v10 = vmax.f32 %v848_v1, 0.0  ;;  %v851_v12 = vadd.f32 %v1275_v8, %v1461_v42  ;;  %v842_v14 = vpop.f32.mrb[27].mxu1 }
 0x119   : > { %v910_v11 = vmax.f32 %v696_v2, 0.0  ;;  %v699_v13 = vadd.f32 %v1461_v42, %v698_v9  ;;  %v946_v15 = vmax.f32 %v840_v6, 0.0  ;;  %v843_v17 = vadd.f32 %v1461_v42, %v842_v14 }
 0x11a   : > { %984 = vst [vmem:[%s1468_s28 + $0xd0] sm:$0xff] %v912_v5  ;;  %v913_v16 = vmax.f32 %v707_v7, 0.0  ;;  %1020 = vst [vmem:[%s1468_s28 + $0x1f0] sm:$0xff] %v948_v10  ;;  %v949_v18 = vmax.f32 %v851_v12, 0.0 }
 0x11b   : > { %982 = vst [vmem:[%s1468_s28 + $0xc0] sm:$0xff] %v910_v11  ;;  %v911_v19 = vmax.f32 %v699_v13, 0.0  ;;  %1018 = vst [vmem:[%s1468_s28 + $0x1e0] sm:$0xff] %v946_v15  ;;  %v947_v20 = vmax.f32 %v843_v17, 0.0 }
 0x11c   : > { %985 = vst [vmem:[%s1468_s28 + $0xd8] sm:$0xff] %v913_v16  ;;  %1021 = vst [vmem:[%s1468_s28 + $0x1f8] sm:$0xff] %v949_v18 }
 0x11d   : > { %983 = vst [vmem:[%s1468_s28 + $0xc8] sm:$0xff] %v911_v19  ;;  %v1242_v21 = vpop.f32.mrb[28].mxu0  ;;  %1019 = vst [vmem:[%s1468_s28 + $0x1e8] sm:$0xff] %v947_v20  ;;  %v1278_v23 = vpop.f32.mrb[28].mxu1 }
 0x11e   : > { %v720_v22 = vadd.f32 %v1242_v21, %v1461_v42  ;;  %v711_v24 = vpop.f32.mrb[29].mxu0  ;;  %v864_v25 = vadd.f32 %v1278_v23, %v1461_v42  ;;  %v855_v27 = vpop.f32.mrb[29].mxu1 }
 0x11f   : > { %v712_v26 = vadd.f32 %v1461_v42, %v711_v24  ;;  %v1243_v28 = vpop.f32.mrb[30].mxu0  ;;  %v856_v30 = vadd.f32 %v1461_v42, %v855_v27  ;;  %v1279_v32 = vpop.f32.mrb[30].mxu1 }
 0x120   : > { %v916_v29 = vmax.f32 %v720_v22, 0.0  ;;  %v723_v31 = vadd.f32 %v1243_v28, %v1461_v42  ;;  %v714_v33 = vpop.f32.mrb[31].mxu0  ;;  %v952_v34 = vmax.f32 %v864_v25, 0.0  ;;  %v867_v36 = vadd.f32 %v1279_v32, %v1461_v42  ;;  %v858_v38 = vpop.f32.mrb[31].mxu1 }
 0x121   : > { %v914_v35 = vmax.f32 %v712_v26, 0.0  ;;  %v715_v37 = vadd.f32 %v1461_v42, %v714_v33  ;;  %v950_v39 = vmax.f32 %v856_v30, 0.0  ;;  %v859_v41 = vadd.f32 %v1461_v42, %v858_v38 }
 0x122   : > { %988 = vst [vmem:[%s1468_s28 + $0xf0] sm:$0xff] %v916_v29  ;;  %v917_v40 = vmax.f32 %v723_v31, 0.0  ;;  %1024 = vst [vmem:[%s1468_s28 + $0x210] sm:$0xff] %v952_v34  ;;  %v953_v43 = vmax.f32 %v867_v36, 0.0 }
 0x123   : > { %986 = vst [vmem:[%s1468_s28 + $0xe0] sm:$0xff] %v914_v35  ;;  %v915_v44 = vmax.f32 %v715_v37, 0.0  ;;  %1022 = vst [vmem:[%s1468_s28 + $0x200] sm:$0xff] %v950_v39  ;;  %v951_v45 = vmax.f32 %v859_v41, 0.0 }
 0x124   : > { %989 = vst [vmem:[%s1468_s28 + $0xf8] sm:$0xff] %v917_v40  ;;  %1025 = vst [vmem:[%s1468_s28 + $0x218] sm:$0xff] %v953_v43 }
 0x125   : > { %987 = vst [vmem:[%s1468_s28 + $0xe8] sm:$0xff] %v915_v44  ;;  %v1246_v46 = vpop.f32.mrb[32].mxu0  ;;  %1023 = vst [vmem:[%s1468_s28 + $0x208] sm:$0xff] %v951_v45  ;;  %v1282_v48 = vpop.f32.mrb[32].mxu1 }
 0x126   : > { %v736_v47 = vadd.f32 %v1246_v46, %v1461_v42  ;;  %v727_v49 = vpop.f32.mrb[33].mxu0  ;;  %v880_v50 = vadd.f32 %v1282_v48, %v1461_v42  ;;  %v871_v52 = vpop.f32.mrb[33].mxu1 }
 0x127   : > { %v728_v51 = vadd.f32 %v1461_v42, %v727_v49  ;;  %v1247_v53 = vpop.f32.mrb[34].mxu0  ;;  %v872_v55 = vadd.f32 %v1461_v42, %v871_v52  ;;  %v1283_v57 = vpop.f32.mrb[34].mxu1 }
 0x128   : > { %v920_v54 = vmax.f32 %v736_v47, 0.0  ;;  %v739_v56 = vadd.f32 %v1247_v53, %v1461_v42  ;;  %v730_v58 = vpop.f32.mrb[35].mxu0  ;;  %v956_v59 = vmax.f32 %v880_v50, 0.0  ;;  %v883_v61 = vadd.f32 %v1283_v57, %v1461_v42  ;;  %v874_v63 = vpop.f32.mrb[35].mxu1 }
 0x129   : > { %v918_v60 = vmax.f32 %v728_v51, 0.0  ;;  %v731_v62 = vadd.f32 %v1461_v42, %v730_v58  ;;  %v954_v0 = vmax.f32 %v872_v55, 0.0  ;;  %v875_v2 = vadd.f32 %v1461_v42, %v874_v63 }
 0x12a   : > { %992 = vst [vmem:[%s1468_s28 + $0x110] sm:$0xff] %v920_v54  ;;  %v921_v1 = vmax.f32 %v739_v56, 0.0  ;;  %1028 = vst [vmem:[%s1468_s28 + $0x230] sm:$0xff] %v956_v59  ;;  %v957_v3 = vmax.f32 %v883_v61, 0.0 }
 0x12b   : > { %990 = vst [vmem:[%s1468_s28 + $0x100] sm:$0xff] %v918_v60  ;;  %v919_v4 = vmax.f32 %v731_v62, 0.0  ;;  %1026 = vst [vmem:[%s1468_s28 + $0x220] sm:$0xff] %v954_v0  ;;  %v955_v5 = vmax.f32 %v875_v2, 0.0 }
 0x12c   : > { %993 = vst [vmem:[%s1468_s28 + $0x118] sm:$0xff] %v921_v1  ;;  %1029 = vst [vmem:[%s1468_s28 + $0x238] sm:$0xff] %v957_v3 }
 0x12d   : > { %991 = vst [vmem:[%s1468_s28 + $0x108] sm:$0xff] %v919_v4  ;;  %1027 = vst [vmem:[%s1468_s28 + $0x228] sm:$0xff] %v955_v5 }
 0x12e PF: > { %s13_s12 = sadd.s32 1, %s1341_s12  }
 0x12f   : > { %p10_p4 = scmp.ge.s32.totalorder %s13_s12, 4  }
 0x131   :  { %12 = sbr.rel (!%p10_p4) target bundleno = 1 (0x1), region = 62 }

// kernel: convnet_forward.6
= control target key start
LH: loop header
LB: loop body
LE: loop exit
PB: predicated region body
PF: predicated region fallthrough
CT: control target
= control target key end

     0   :  { %s874_s0 = inlined_call_operand.vmem [shape: f32[288,128], index: 0, kind: input, shape index: {}]   ;;  %s875_s1 = inlined_call_operand.vmem [shape: f32[288,128], index: 1, kind: input, shape index: {}]   ;;  %s876_s2 = inlined_call_operand.vmem [shape: f32[288,128], index: 2, kind: input, shape index: {}]   ;;  %s877_s3 = inlined_call_operand.vmem [shape: f32[288,128], index: 3, kind: input, shape index: {}]   ;;  %s878_s4 = inlined_call_operand.vmem [shape: f32[288,128], index: 4, kind: output, shape index: {}]  }
   0x1   :  { %v17_v0 = vld [vmem:[%s874_s0] sm:$0xff]  ;;  %v18_v5 = vld [vmem:[%s874_s0 + $0x8] sm:$0xff]  ;;  %v19_v11 = vld [vmem:[%s874_s0 + $0x10] sm:$0xff] }
   0x2   :  { %v53_v1 = vld [vmem:[%s875_s1] sm:$0xff]  ;;  %v54_v6 = vld [vmem:[%s875_s1 + $0x8] sm:$0xff]  ;;  %v55_v13 = vld [vmem:[%s875_s1 + $0x10] sm:$0xff] }
   0x3   :  { %v125_v2 = vld [vmem:[%s876_s2] sm:$0xff]  ;;  %v89_v3 = vmax.f32 %v17_v0, %v53_v1  ;;  %v90_v8 = vmax.f32 %v18_v5, %v54_v6  ;;  %v126_v9 = vld [vmem:[%s876_s2 + $0x8] sm:$0xff]  ;;  %v127_v14 = vld [vmem:[%s876_s2 + $0x10] sm:$0xff]  ;;  %v91_v17 = vmax.f32 %v19_v11, %v55_v13 }
   0x4   :  { %v161_v4 = vld [vmem:[%s877_s3] sm:$0xff]  ;;  %v162_v10 = vld [vmem:[%s877_s3 + $0x8] sm:$0xff]  ;;  %v163_v15 = vld [vmem:[%s877_s3 + $0x10] sm:$0xff] }
   0x5   :  { %v197_v7 = vmax.f32 %v125_v2, %v161_v4  ;;  %v198_v12 = vmax.f32 %v126_v9, %v162_v10  ;;  %v199_v18 = vmax.f32 %v127_v14, %v163_v15  ;;  %v20_v19 = vld [vmem:[%s874_s0 + $0x18] sm:$0xff]  ;;  %v21_v25 = vld [vmem:[%s874_s0 + $0x20] sm:$0xff]  ;;  %v22_v32 = vld [vmem:[%s874_s0 + $0x28] sm:$0xff] }
   0x6   :  { %v56_v20 = vld [vmem:[%s875_s1 + $0x18] sm:$0xff]  ;;  %v57_v26 = vld [vmem:[%s875_s1 + $0x20] sm:$0xff]  ;;  %v58_v34 = vld [vmem:[%s875_s1 + $0x28] sm:$0xff] }
   0x7   :  { %v233_v16 = vmax.f32 %v89_v3, %v197_v7  ;;  %v128_v21 = vld [vmem:[%s876_s2 + $0x18] sm:$0xff]  ;;  %v234_v22 = vmax.f32 %v90_v8, %v198_v12  ;;  %v92_v23 = vmax.f32 %v20_v19, %v56_v20  ;;  %v235_v27 = vmax.f32 %v91_v17, %v199_v18  ;;  %v129_v30 = vld [vmem:[%s876_s2 + $0x20] sm:$0xff]  ;;  %v130_v35 = vld [vmem:[%s876_s2 + $0x28] sm:$0xff] }
   0x8   :  { %v164_v24 = vld [vmem:[%s877_s3 + $0x18] sm:$0xff]  ;;  %v93_v29 = vmax.f32 %v21_v25, %v57_v26  ;;  %v165_v31 = vld [vmem:[%s877_s3 + $0x20] sm:$0xff]  ;;  %v166_v36 = vld [vmem:[%s877_s3 + $0x28] sm:$0xff]  ;;  %v94_v38 = vmax.f32 %v22_v32, %v58_v34 }
   0x9   :  { %269 = vst [vmem:[%s878_s4] sm:$0xff] %v233_v16  ;;  %v200_v28 = vmax.f32 %v128_v21, %v164_v24  ;;  %270 = vst [vmem:[%s878_s4 + $0x8] sm:$0xff] %v234_v22  ;;  %v201_v33 = vmax.f32 %v129_v30, %v165_v31  ;;  %v202_v39 = vmax.f32 %v130_v35, %v166_v36  ;;  %v23_v40 = vld [vmem:[%s874_s0 + $0x30] sm:$0xff]  ;;  %v24_v46 = vld [vmem:[%s874_s0 + $0x38] sm:$0xff] }
   0xa   :  { %271 = vst [vmem:[%s878_s4 + $0x10] sm:$0xff] %v235_v27  ;;  %v59_v41 = vld [vmem:[%s875_s1 + $0x30] sm:$0xff]  ;;  %v60_v47 = vld [vmem:[%s875_s1 + $0x38] sm:$0xff]  ;;  %v25_v53 = vld [vmem:[%s874_s0 + $0x40] sm:$0xff] }
   0xb   :  { %v236_v37 = vmax.f32 %v92_v23, %v200_v28  ;;  %v131_v42 = vld [vmem:[%s876_s2 + $0x30] sm:$0xff]  ;;  %v237_v43 = vmax.f32 %v93_v29, %v201_v33  ;;  %v95_v44 = vmax.f32 %v23_v40, %v59_v41  ;;  %v238_v48 = vmax.f32 %v94_v38, %v202_v39  ;;  %v132_v51 = vld [vmem:[%s876_s2 + $0x38] sm:$0xff]  ;;  %v61_v55 = vld [vmem:[%s875_s1 + $0x40] sm:$0xff] }
   0xc   :  { %v167_v45 = vld [vmem:[%s877_s3 + $0x30] sm:$0xff]  ;;  %v96_v50 = vmax.f32 %v24_v46, %v60_v47  ;;  %v168_v52 = vld [vmem:[%s877_s3 + $0x38] sm:$0xff]  ;;  %v133_v56 = vld [vmem:[%s876_s2 + $0x40] sm:$0xff]  ;;  %v97_v59 = vmax.f32 %v25_v53, %v61_v55 }
   0xd   :  { %272 = vst [vmem:[%s878_s4 + $0x18] sm:$0xff] %v236_v37  ;;  %v203_v49 = vmax.f32 %v131_v42, %v167_v45  ;;  %273 = vst [vmem:[%s878_s4 + $0x20] sm:$0xff] %v237_v43  ;;  %v204_v54 = vmax.f32 %v132_v51, %v168_v52  ;;  %v169_v57 = vld [vmem:[%s877_s3 + $0x40] sm:$0xff]  ;;  %v26_v61 = vld [vmem:[%s874_s0 + $0x48] sm:$0xff] }
   0xe   :  { %274 = vst [vmem:[%s878_s4 + $0x28] sm:$0xff] %v238_v48  ;;  %v205_v60 = vmax.f32 %v133_v56, %v169_v57  ;;  %v62_v62 = vld [vmem:[%s875_s1 + $0x48] sm:$0xff]  ;;  %v27_v3 = vld [vmem:[%s874_s0 + $0x50] sm:$0xff]  ;;  %v28_v10 = vld [vmem:[%s874_s0 + $0x58] sm:$0xff] }
   0xf   :  { %v239_v58 = vmax.f32 %v95_v44, %v203_v49  ;;  %v134_v63 = vld [vmem:[%s876_s2 + $0x48] sm:$0xff]  ;;  %v240_v0 = vmax.f32 %v96_v50, %v204_v54  ;;  %v98_v1 = vmax.f32 %v26_v61, %v62_v62  ;;  %v63_v4 = vld [vmem:[%s875_s1 + $0x50] sm:$0xff]  ;;  %v64_v12 = vld [vmem:[%s875_s1 + $0x58] sm:$0xff] }
  0x10   :  { %v170_v2 = vld [vmem:[%s877_s3 + $0x48] sm:$0xff]  ;;  %v241_v5 = vmax.f32 %v97_v59, %v205_v60  ;;  %v99_v7 = vmax.f32 %v27_v3, %v63_v4  ;;  %v135_v8 = vld [vmem:[%s876_s2 + $0x50] sm:$0xff]  ;;  %v136_v13 = vld [vmem:[%s876_s2 + $0x58] sm:$0xff]  ;;  %v100_v16 = vmax.f32 %v28_v10, %v64_v12 }
  0x11   :  { %275 = vst [vmem:[%s878_s4 + $0x30] sm:$0xff] %v239_v58  ;;  %v206_v6 = vmax.f32 %v134_v63, %v170_v2  ;;  %v171_v9 = vld [vmem:[%s877_s3 + $0x50] sm:$0xff]  ;;  %276 = vst [vmem:[%s878_s4 + $0x38] sm:$0xff] %v240_v0  ;;  %v172_v14 = vld [vmem:[%s877_s3 + $0x58] sm:$0xff] }
  0x12   :  { %v207_v11 = vmax.f32 %v135_v8, %v171_v9  ;;  %277 = vst [vmem:[%s878_s4 + $0x40] sm:$0xff] %v241_v5  ;;  %v208_v17 = vmax.f32 %v136_v13, %v172_v14  ;;  %v29_v18 = vld [vmem:[%s874_s0 + $0x60] sm:$0xff]  ;;  %v30_v24 = vld [vmem:[%s874_s0 + $0x68] sm:$0xff]  ;;  %v31_v31 = vld [vmem:[%s874_s0 + $0x70] sm:$0xff] }
  0x13   :  { %v242_v15 = vmax.f32 %v98_v1, %v206_v6  ;;  %v65_v19 = vld [vmem:[%s875_s1 + $0x60] sm:$0xff]  ;;  %v66_v25 = vld [vmem:[%s875_s1 + $0x68] sm:$0xff]  ;;  %v67_v33 = vld [vmem:[%s875_s1 + $0x70] sm:$0xff] }
  0x14   :  { %v137_v20 = vld [vmem:[%s876_s2 + $0x60] sm:$0xff]  ;;  %v243_v21 = vmax.f32 %v99_v7, %v207_v11  ;;  %v101_v22 = vmax.f32 %v29_v18, %v65_v19  ;;  %v244_v26 = vmax.f32 %v100_v16, %v208_v17  ;;  %v102_v28 = vmax.f32 %v30_v24, %v66_v25  ;;  %v138_v29 = vld [vmem:[%s876_s2 + $0x68] sm:$0xff]  ;;  %v139_v34 = vld [vmem:[%s876_s2 + $0x70] sm:$0xff] }
  0x15   :  { %v173_v23 = vld [vmem:[%s877_s3 + $0x60] sm:$0xff]  ;;  %278 = vst [vmem:[%s878_s4 + $0x48] sm:$0xff] %v242_v15  ;;  %v174_v30 = vld [vmem:[%s877_s3 + $0x68] sm:$0xff]  ;;  %v175_v35 = vld [vmem:[%s877_s3 + $0x70] sm:$0xff]  ;;  %v103_v37 = vmax.f32 %v31_v31, %v67_v33 }
  0x16   :  { %v209_v27 = vmax.f32 %v137_v20, %v173_v23  ;;  %279 = vst [vmem:[%s878_s4 + $0x50] sm:$0xff] %v243_v21  ;;  %v210_v32 = vmax.f32 %v138_v29, %v174_v30  ;;  %280 = vst [vmem:[%s878_s4 + $0x58] sm:$0xff] %v244_v26  ;;  %v211_v38 = vmax.f32 %v139_v34, %v175_v35  ;;  %v32_v39 = vld [vmem:[%s874_s0 + $0x78] sm:$0xff]  ;;  %v33_v45 = vld [vmem:[%s874_s0 + $0x80] sm:$0xff] }
  0x17   :  { %v68_v40 = vld [vmem:[%s875_s1 + $0x78] sm:$0xff]  ;;  %v69_v46 = vld [vmem:[%s875_s1 + $0x80] sm:$0xff]  ;;  %v34_v52 = vld [vmem:[%s874_s0 + $0x88] sm:$0xff] }
  0x18   :  { %v245_v36 = vmax.f32 %v101_v22, %v209_v27  ;;  %v140_v41 = vld [vmem:[%s876_s2 + $0x78] sm:$0xff]  ;;  %v246_v42 = vmax.f32 %v102_v28, %v210_v32  ;;  %v104_v43 = vmax.f32 %v32_v39, %v68_v40  ;;  %v247_v47 = vmax.f32 %v103_v37, %v211_v38  ;;  %v141_v50 = vld [vmem:[%s876_s2 + $0x80] sm:$0xff]  ;;  %v70_v54 = vld [vmem:[%s875_s1 + $0x88] sm:$0xff] }
  0x19   :  { %v176_v44 = vld [vmem:[%s877_s3 + $0x78] sm:$0xff]  ;;  %v105_v49 = vmax.f32 %v33_v45, %v69_v46  ;;  %v177_v51 = vld [vmem:[%s877_s3 + $0x80] sm:$0xff]  ;;  %v142_v55 = vld [vmem:[%s876_s2 + $0x88] sm:$0xff]  ;;  %v106_v58 = vmax.f32 %v34_v52, %v70_v54 }
  0x1a   :  { %281 = vst [vmem:[%s878_s4 + $0x60] sm:$0xff] %v245_v36  ;;  %v212_v48 = vmax.f32 %v140_v41, %v176_v44  ;;  %282 = vst [vmem:[%s878_s4 + $0x68] sm:$0xff] %v246_v42  ;;  %v213_v53 = vmax.f32 %v141_v50, %v177_v51  ;;  %v178_v56 = vld [vmem:[%s877_s3 + $0x88] sm:$0xff]  ;;  %v35_v60 = vld [vmem:[%s874_s0 + $0x90] sm:$0xff] }
  0x1b   :  { %283 = vst [vmem:[%s878_s4 + $0x70] sm:$0xff] %v247_v47  ;;  %v214_v59 = vmax.f32 %v142_v55, %v178_v56  ;;  %v71_v61 = vld [vmem:[%s875_s1 + $0x90] sm:$0xff]  ;;  %v36_v2 = vld [vmem:[%s874_s0 + $0x98] sm:$0xff]  ;;  %v37_v9 = vld [vmem:[%s874_s0 + $0xa0] sm:$0xff] }
  0x1c   :  { %v248_v57 = vmax.f32 %v104_v43, %v212_v48  ;;  %v143_v62 = vld [vmem:[%s876_s2 + $0x90] sm:$0xff]  ;;  %v249_v63 = vmax.f32 %v105_v49, %v213_v53  ;;  %v107_v0 = vmax.f32 %v35_v60, %v71_v61  ;;  %v72_v3 = vld [vmem:[%s875_s1 + $0x98] sm:$0xff]  ;;  %v73_v11 = vld [vmem:[%s875_s1 + $0xa0] sm:$0xff] }
  0x1d   :  { %v179_v1 = vld [vmem:[%s877_s3 + $0x90] sm:$0xff]  ;;  %v250_v4 = vmax.f32 %v106_v58, %v214_v59  ;;  %v108_v6 = vmax.f32 %v36_v2, %v72_v3  ;;  %v144_v7 = vld [vmem:[%s876_s2 + $0x98] sm:$0xff]  ;;  %v145_v12 = vld [vmem:[%s876_s2 + $0xa0] sm:$0xff]  ;;  %v109_v15 = vmax.f32 %v37_v9, %v73_v11 }
  0x1e   :  { %284 = vst [vmem:[%s878_s4 + $0x78] sm:$0xff] %v248_v57  ;;  %v215_v5 = vmax.f32 %v143_v62, %v179_v1  ;;  %v180_v8 = vld [vmem:[%s877_s3 + $0x98] sm:$0xff]  ;;  %285 = vst [vmem:[%s878_s4 + $0x80] sm:$0xff] %v249_v63  ;;  %v181_v13 = vld [vmem:[%s877_s3 + $0xa0] sm:$0xff] }
  0x1f   :  { %v216_v10 = vmax.f32 %v144_v7, %v180_v8  ;;  %286 = vst [vmem:[%s878_s4 + $0x88] sm:$0xff] %v250_v4  ;;  %v217_v16 = vmax.f32 %v145_v12, %v181_v13  ;;  %v38_v17 = vld [vmem:[%s874_s0 + $0xa8] sm:$0xff]  ;;  %v39_v23 = vld [vmem:[%s874_s0 + $0xb0] sm:$0xff]  ;;  %v40_v30 = vld [vmem:[%s874_s0 + $0xb8] sm:$0xff] }
  0x20   :  { %v251_v14 = vmax.f32 %v107_v0, %v215_v5  ;;  %v74_v18 = vld [vmem:[%s875_s1 + $0xa8] sm:$0xff]  ;;  %v75_v24 = vld [vmem:[%s875_s1 + $0xb0] sm:$0xff]  ;;  %v76_v32 = vld [vmem:[%s875_s1 + $0xb8] sm:$0xff] }
  0x21   :  { %v146_v19 = vld [vmem:[%s876_s2 + $0xa8] sm:$0xff]  ;;  %v252_v20 = vmax.f32 %v108_v6, %v216_v10  ;;  %v110_v21 = vmax.f32 %v38_v17, %v74_v18  ;;  %v253_v25 = vmax.f32 %v109_v15, %v217_v16  ;;  %v111_v27 = vmax.f32 %v39_v23, %v75_v24  ;;  %v147_v28 = vld [vmem:[%s876_s2 + $0xb0] sm:$0xff]  ;;  %v148_v33 = vld [vmem:[%s876_s2 + $0xb8] sm:$0xff] }
  0x22   :  { %v182_v22 = vld [vmem:[%s877_s3 + $0xa8] sm:$0xff]  ;;  %287 = vst [vmem:[%s878_s4 + $0x90] sm:$0xff] %v251_v14  ;;  %v183_v29 = vld [vmem:[%s877_s3 + $0xb0] sm:$0xff]  ;;  %v184_v34 = vld [vmem:[%s877_s3 + $0xb8] sm:$0xff]  ;;  %v112_v36 = vmax.f32 %v40_v30, %v76_v32 }
  0x23   :  { %v218_v26 = vmax.f32 %v146_v19, %v182_v22  ;;  %288 = vst [vmem:[%s878_s4 + $0x98] sm:$0xff] %v252_v20  ;;  %v219_v31 = vmax.f32 %v147_v28, %v183_v29  ;;  %289 = vst [vmem:[%s878_s4 + $0xa0] sm:$0xff] %v253_v25  ;;  %v220_v37 = vmax.f32 %v148_v33, %v184_v34  ;;  %v41_v38 = vld [vmem:[%s874_s0 + $0xc0] sm:$0xff]  ;;  %v42_v44 = vld [vmem:[%s874_s0 + $0xc8] sm:$0xff] }
  0x24   :  { %v77_v39 = vld [vmem:[%s875_s1 + $0xc0] sm:$0xff]  ;;  %v78_v45 = vld [vmem:[%s875_s1 + $0xc8] sm:$0xff]  ;;  %v43_v51 = vld [vmem:[%s874_s0 + $0xd0] sm:$0xff] }
  0x25   :  { %v254_v35 = vmax.f32 %v110_v21, %v218_v26  ;;  %v149_v40 = vld [vmem:[%s876_s2 + $0xc0] sm:$0xff]  ;;  %v255_v41 = vmax.f32 %v111_v27, %v219_v31  ;;  %v113_v42 = vmax.f32 %v41_v38, %v77_v39  ;;  %v256_v46 = vmax.f32 %v112_v36, %v220_v37  ;;  %v150_v49 = vld [vmem:[%s876_s2 + $0xc8] sm:$0xff]  ;;  %v79_v53 = vld [vmem:[%s875_s1 + $0xd0] sm:$0xff] }
  0x26   :  { %v185_v43 = vld [vmem:[%s877_s3 + $0xc0] sm:$0xff]  ;;  %v114_v48 = vmax.f32 %v42_v44, %v78_v45  ;;  %v186_v50 = vld [vmem:[%s877_s3 + $0xc8] sm:$0xff]  ;;  %v151_v54 = vld [vmem:[%s876_s2 + $0xd0] sm:$0xff]  ;;  %v115_v57 = vmax.f32 %v43_v51, %v79_v53 }
  0x27   :  { %290 = vst [vmem:[%s878_s4 + $0xa8] sm:$0xff] %v254_v35  ;;  %v221_v47 = vmax.f32 %v149_v40, %v185_v43  ;;  %291 = vst [vmem:[%s878_s4 + $0xb0] sm:$0xff] %v255_v41  ;;  %v222_v52 = vmax.f32 %v150_v49, %v186_v50  ;;  %v187_v55 = vld [vmem:[%s877_s3 + $0xd0] sm:$0xff]  ;;  %v44_v59 = vld [vmem:[%s874_s0 + $0xd8] sm:$0xff] }
  0x28   :  { %292 = vst [vmem:[%s878_s4 + $0xb8] sm:$0xff] %v256_v46  ;;  %v223_v58 = vmax.f32 %v151_v54, %v187_v55  ;;  %v80_v60 = vld [vmem:[%s875_s1 + $0xd8] sm:$0xff]  ;;  %v45_v1 = vld [vmem:[%s874_s0 + $0xe0] sm:$0xff]  ;;  %v46_v8 = vld [vmem:[%s874_s0 + $0xe8] sm:$0xff] }
  0x29   :  { %v257_v56 = vmax.f32 %v113_v42, %v221_v47  ;;  %v152_v61 = vld [vmem:[%s876_s2 + $0xd8] sm:$0xff]  ;;  %v258_v62 = vmax.f32 %v114_v48, %v222_v52  ;;  %v116_v63 = vmax.f32 %v44_v59, %v80_v60  ;;  %v81_v2 = vld [vmem:[%s875_s1 + $0xe0] sm:$0xff]  ;;  %v82_v10 = vld [vmem:[%s875_s1 + $0xe8] sm:$0xff] }
  0x2a   :  { %v188_v0 = vld [vmem:[%s877_s3 + $0xd8] sm:$0xff]  ;;  %v259_v3 = vmax.f32 %v115_v57, %v223_v58  ;;  %v117_v5 = vmax.f32 %v45_v1, %v81_v2  ;;  %v153_v6 = vld [vmem:[%s876_s2 + $0xe0] sm:$0xff]  ;;  %v154_v11 = vld [vmem:[%s876_s2 + $0xe8] sm:$0xff]  ;;  %v118_v14 = vmax.f32 %v46_v8, %v82_v10 }
  0x2b   :  { %293 = vst [vmem:[%s878_s4 + $0xc0] sm:$0xff] %v257_v56  ;;  %v224_v4 = vmax.f32 %v152_v61, %v188_v0  ;;  %v189_v7 = vld [vmem:[%s877_s3 + $0xe0] sm:$0xff]  ;;  %294 = vst [vmem:[%s878_s4 + $0xc8] sm:$0xff] %v258_v62  ;;  %v190_v12 = vld [vmem:[%s877_s3 + $0xe8] sm:$0xff] }
  0x2c   :  { %v225_v9 = vmax.f32 %v153_v6, %v189_v7  ;;  %295 = vst [vmem:[%s878_s4 + $0xd0] sm:$0xff] %v259_v3  ;;  %v226_v15 = vmax.f32 %v154_v11, %v190_v12  ;;  %v47_v16 = vld [vmem:[%s874_s0 + $0xf0] sm:$0xff]  ;;  %v48_v22 = vld [vmem:[%s874_s0 + $0xf8] sm:$0xff]  ;;  %v49_v29 = vld [vmem:[%s874_s0 + $0x100] sm:$0xff] }
  0x2d   :  { %v260_v13 = vmax.f32 %v116_v63, %v224_v4  ;;  %v83_v17 = vld [vmem:[%s875_s1 + $0xf0] sm:$0xff]  ;;  %v84_v23 = vld [vmem:[%s875_s1 + $0xf8] sm:$0xff]  ;;  %v85_v31 = vld [vmem:[%s875_s1 + $0x100] sm:$0xff] }
  0x2e   :  { %v155_v18 = vld [vmem:[%s876_s2 + $0xf0] sm:$0xff]  ;;  %v261_v19 = vmax.f32 %v117_v5, %v225_v9  ;;  %v119_v20 = vmax.f32 %v47_v16, %v83_v17  ;;  %v262_v24 = vmax.f32 %v118_v14, %v226_v15  ;;  %v120_v26 = vmax.f32 %v48_v22, %v84_v23  ;;  %v156_v27 = vld [vmem:[%s876_s2 + $0xf8] sm:$0xff]  ;;  %v157_v32 = vld [vmem:[%s876_s2 + $0x100] sm:$0xff] }
  0x2f   :  { %v191_v21 = vld [vmem:[%s877_s3 + $0xf0] sm:$0xff]  ;;  %296 = vst [vmem:[%s878_s4 + $0xd8] sm:$0xff] %v260_v13  ;;  %v192_v28 = vld [vmem:[%s877_s3 + $0xf8] sm:$0xff]  ;;  %v193_v33 = vld [vmem:[%s877_s3 + $0x100] sm:$0xff]  ;;  %v121_v35 = vmax.f32 %v49_v29, %v85_v31 }
  0x30   :  { %v227_v25 = vmax.f32 %v155_v18, %v191_v21  ;;  %297 = vst [vmem:[%s878_s4 + $0xe0] sm:$0xff] %v261_v19  ;;  %v228_v30 = vmax.f32 %v156_v27, %v192_v28  ;;  %298 = vst [vmem:[%s878_s4 + $0xe8] sm:$0xff] %v262_v24  ;;  %v229_v36 = vmax.f32 %v157_v32, %v193_v33  ;;  %v50_v37 = vld [vmem:[%s874_s0 + $0x108] sm:$0xff]  ;;  %v51_v43 = vld [vmem:[%s874_s0 + $0x110] sm:$0xff] }
  0x31   :  { %v86_v38 = vld [vmem:[%s875_s1 + $0x108] sm:$0xff]  ;;  %v87_v44 = vld [vmem:[%s875_s1 + $0x110] sm:$0xff]  ;;  %v52_v50 = vld [vmem:[%s874_s0 + $0x118] sm:$0xff] }
  0x32   :  { %v263_v34 = vmax.f32 %v119_v20, %v227_v25  ;;  %v158_v39 = vld [vmem:[%s876_s2 + $0x108] sm:$0xff]  ;;  %v264_v40 = vmax.f32 %v120_v26, %v228_v30  ;;  %v122_v41 = vmax.f32 %v50_v37, %v86_v38  ;;  %v265_v45 = vmax.f32 %v121_v35, %v229_v36  ;;  %v159_v48 = vld [vmem:[%s876_s2 + $0x110] sm:$0xff]  ;;  %v88_v52 = vld [vmem:[%s875_s1 + $0x118] sm:$0xff] }
  0x33   :  { %v194_v42 = vld [vmem:[%s877_s3 + $0x108] sm:$0xff]  ;;  %v123_v47 = vmax.f32 %v51_v43, %v87_v44  ;;  %v195_v49 = vld [vmem:[%s877_s3 + $0x110] sm:$0xff]  ;;  %v160_v53 = vld [vmem:[%s876_s2 + $0x118] sm:$0xff]  ;;  %v124_v56 = vmax.f32 %v52_v50, %v88_v52 }
  0x34   :  { %299 = vst [vmem:[%s878_s4 + $0xf0] sm:$0xff] %v263_v34  ;;  %v230_v46 = vmax.f32 %v158_v39, %v194_v42  ;;  %300 = vst [vmem:[%s878_s4 + $0xf8] sm:$0xff] %v264_v40  ;;  %v231_v51 = vmax.f32 %v159_v48, %v195_v49  ;;  %v196_v54 = vld [vmem:[%s877_s3 + $0x118] sm:$0xff] }
  0x35   :  { %301 = vst [vmem:[%s878_s4 + $0x100] sm:$0xff] %v265_v45  ;;  %v232_v57 = vmax.f32 %v160_v53, %v196_v54 }
  0x36   :  { %v266_v55 = vmax.f32 %v122_v41, %v230_v46  ;;  %v267_v58 = vmax.f32 %v123_v47, %v231_v51 }
  0x37   :  { %v268_v59 = vmax.f32 %v124_v56, %v232_v57 }
  0x38   :  { %302 = vst [vmem:[%s878_s4 + $0x108] sm:$0xff] %v266_v55  ;;  %303 = vst [vmem:[%s878_s4 + $0x110] sm:$0xff] %v267_v58 }
  0x39   :  { %304 = vst [vmem:[%s878_s4 + $0x118] sm:$0xff] %v268_v59 }

// kernel: convnet_forward.8
= control target key start
LH: loop header
LB: loop body
LE: loop exit
PB: predicated region body
PF: predicated region fallthrough
CT: control target
= control target key end

     0   :  { %s138_s0 = inlined_call_operand.vmem [shape: f32[32,128], index: 0, kind: input, shape index: {}]   ;;  %s139_s1 = inlined_call_operand.vmem [shape: f32[32,128], index: 1, kind: input, shape index: {}]   ;;  %s140_s2 = inlined_call_operand.vmem [shape: f32[32,128], index: 2, kind: input, shape index: {}]   ;;  %s141_s3 = inlined_call_operand.vmem [shape: f32[32,128], index: 3, kind: input, shape index: {}]   ;;  %s142_s4 = inlined_call_operand.vmem [shape: f32[32,128], index: 4, kind: output, shape index: {}]  }
   0x1   :  { %v17_v0 = vld [vmem:[%s138_s0] sm:$0xff]  ;;  %v18_v5 = vld [vmem:[%s138_s0 + $0x8] sm:$0xff]  ;;  %v19_v11 = vld [vmem:[%s138_s0 + $0x10] sm:$0xff] }
   0x2   :  { %v21_v1 = vld [vmem:[%s139_s1] sm:$0xff]  ;;  %v22_v6 = vld [vmem:[%s139_s1 + $0x8] sm:$0xff]  ;;  %v23_v13 = vld [vmem:[%s139_s1 + $0x10] sm:$0xff] }
   0x3   :  { %v29_v2 = vld [vmem:[%s140_s2] sm:$0xff]  ;;  %v25_v3 = vmax.f32 %v17_v0, %v21_v1  ;;  %v26_v8 = vmax.f32 %v18_v5, %v22_v6  ;;  %v30_v9 = vld [vmem:[%s140_s2 + $0x8] sm:$0xff]  ;;  %v31_v14 = vld [vmem:[%s140_s2 + $0x10] sm:$0xff]  ;;  %v27_v17 = vmax.f32 %v19_v11, %v23_v13 }
   0x4   :  { %v33_v4 = vld [vmem:[%s141_s3] sm:$0xff]  ;;  %v34_v10 = vld [vmem:[%s141_s3 + $0x8] sm:$0xff]  ;;  %v35_v15 = vld [vmem:[%s141_s3 + $0x10] sm:$0xff] }
   0x5   :  { %v37_v7 = vmax.f32 %v29_v2, %v33_v4  ;;  %v38_v12 = vmax.f32 %v30_v9, %v34_v10  ;;  %v39_v18 = vmax.f32 %v31_v14, %v35_v15  ;;  %v20_v19 = vld [vmem:[%s138_s0 + $0x18] sm:$0xff] }
   0x6   :  { %v24_v20 = vld [vmem:[%s139_s1 + $0x18] sm:$0xff] }
   0x7   :  { %v41_v16 = vmax.f32 %v25_v3, %v37_v7  ;;  %v32_v21 = vld [vmem:[%s140_s2 + $0x18] sm:$0xff]  ;;  %v42_v22 = vmax.f32 %v26_v8, %v38_v12  ;;  %v28_v23 = vmax.f32 %v20_v19, %v24_v20  ;;  %v43_v25 = vmax.f32 %v27_v17, %v39_v18 }
   0x8   :  { %v36_v24 = vld [vmem:[%s141_s3 + $0x18] sm:$0xff] }
   0x9   :  { %45 = vst [vmem:[%s142_s4] sm:$0xff] %v41_v16  ;;  %v40_v26 = vmax.f32 %v32_v21, %v36_v24  ;;  %46 = vst [vmem:[%s142_s4 + $0x8] sm:$0xff] %v42_v22 }
   0xa   :  { %47 = vst [vmem:[%s142_s4 + $0x10] sm:$0xff] %v43_v25 }
   0xb   :  { %v44_v27 = vmax.f32 %v28_v23, %v40_v26 }
   0xd   :  { %48 = vst [vmem:[%s142_s4 + $0x18] sm:$0xff] %v44_v27 }

// kernel: convnet_forward.7
= control target key start
LH: loop header
LB: loop body
LE: loop exit
PB: predicated region body
PF: predicated region fallthrough
CT: control target
= control target key end

     0   :  { %v1743_v42 = vmov 0   ;;  %vm923_vm0 = vcmask 1043456   ;;  %vm898_vm1 = vcmask 850944   ;;  %s2285_s1 = inlined_call_operand.vmem [shape: bf16[1000,128], index: 1, kind: input, shape index: {}]   ;;  %s2286_s0 = inlined_call_operand.vmem [shape: bf16[128,1000], index: 0, kind: input, shape index: {}]   ;;  %s2287_s2 = inlined_call_operand.vmem [shape: f32[1,128], index: 2, kind: input, shape index: {}]   ;;  %s2288_s3 = inlined_call_operand.vmem [shape: f32[128,128], index: 3, kind: output, shape index: {}]  }
   0x1   :  { %v1680_v0 = vld [vmem:[%s2285_s1 + $0x40] sm:$0xff]   ;;  %v1684_v4 = vld [vmem:[%s2285_s1 + $0x48] sm:$0xff]   ;;  %v1688_v8 = vld [vmem:[%s2285_s1 + $0x50] sm:$0xff]  }
   0x2   :  { %v1681_v1 = vld [vmem:[%s2285_s1] sm:$0xff]   ;;  %1487 = vmatprep.subr.bf16.mxu0 %v1680_v0  ;;  %v1685_v5 = vld [vmem:[%s2285_s1 + $0x8] sm:$0xff]   ;;  %v1689_v9 = vld [vmem:[%s2285_s1 + $0x10] sm:$0xff]  }
   0x3   :  { %v1682_v2 = vld [vmem:[%s2285_s1 + $0xc0] sm:$0xff]   ;;  %1488 = vmatpush3.bf16.msra.mxu0 %v1681_v1  ;;  %v1686_v6 = vld [vmem:[%s2285_s1 + $0xc8] sm:$0xff]   ;;  %v1690_v10 = vld [vmem:[%s2285_s1 + $0xd0] sm:$0xff]  }
   0x4   :  { %v1683_v3 = vld [vmem:[%s2285_s1 + $0x80] sm:$0xff]   ;;  %1551 = vmatprep.subr.bf16.mxu1 %v1682_v2  ;;  %1489 = vmatprep.subr.bf16.mxu0 %v1684_v4  ;;  %v1687_v7 = vld [vmem:[%s2285_s1 + $0x88] sm:$0xff]   ;;  %v1691_v11 = vld [vmem:[%s2285_s1 + $0x90] sm:$0xff]  }
   0x5   :  { %1552 = vmatpush3.bf16.msra.mxu1 %v1683_v3  ;;  %v1692_v12 = vld [vmem:[%s2285_s1 + $0x58] sm:$0xff]   ;;  %v1696_v16 = vld [vmem:[%s2285_s1 + $0x60] sm:$0xff]   ;;  %v1700_v20 = vld [vmem:[%s2285_s1 + $0x68] sm:$0xff]  }
   0x6   :  { %1553 = vmatprep.subr.bf16.mxu1 %v1686_v6  ;;  %v1693_v13 = vld [vmem:[%s2285_s1 + $0x18] sm:$0xff]   ;;  %v1697_v17 = vld [vmem:[%s2285_s1 + $0x20] sm:$0xff]   ;;  %v1701_v21 = vld [vmem:[%s2285_s1 + $0x28] sm:$0xff]  }
   0x7   :  { %1490 = vmatpush3.bf16.msra.mxu0 %v1685_v5  ;;  %v1694_v14 = vld [vmem:[%s2285_s1 + $0xd8] sm:$0xff]   ;;  %v1698_v18 = vld [vmem:[%s2285_s1 + $0xe0] sm:$0xff]   ;;  %v1702_v22 = vld [vmem:[%s2285_s1 + $0xe8] sm:$0xff]  }
   0x8   :  { %1491 = vmatprep.subr.bf16.mxu0 %v1688_v8  ;;  %v1695_v15 = vld [vmem:[%s2285_s1 + $0x98] sm:$0xff]   ;;  %v1699_v19 = vld [vmem:[%s2285_s1 + $0xa0] sm:$0xff]   ;;  %v1703_v23 = vld [vmem:[%s2285_s1 + $0xa8] sm:$0xff]  }
   0x9   :  { %1554 = vmatpush3.bf16.msra.mxu1 %v1687_v7  ;;  %v1704_v24 = vld [vmem:[%s2285_s1 + $0x70] sm:$0xff]   ;;  %v1708_v28 = vld [vmem:[%s2285_s1 + $0x78] sm:$0xff]   ;;  %v15_v31 = vld [vmem:[%s2286_s0] sm:$0xff] }
   0xa   :  { %1555 = vmatprep.subr.bf16.mxu1 %v1690_v10  ;;  %v1705_v25 = vld [vmem:[%s2285_s1 + $0x30] sm:$0xff]   ;;  %v1709_v29 = vld [vmem:[%s2285_s1 + $0x38] sm:$0xff]   ;;  %v19_v32 = vld [vmem:[%s2286_s0 + $0x20] sm:$0xff] }
   0xb   :  { %1492 = vmatpush3.bf16.msra.mxu0 %v1689_v9  ;;  %v1706_v26 = vld [vmem:[%s2285_s1 + $0xf0] sm:$0xff]   ;;  %v1710_v30 = vld [vmem:[%s2285_s1 + $0xf8] sm:$0xff]   ;;  %v1352_v33 = vcombine.low %v15_v31, %v19_v32  ;;  %v1353_v34 = vcombine.high %v15_v31, %v19_v32  ;;  %v1712_v36 = vld [vmem:[%s2285_s1 + $0x140] sm:$0xff]  }
   0xc   :  { %1493 = vmatprep.subr.bf16.mxu0 %v1692_v12  ;;  %v1707_v27 = vld [vmem:[%s2285_s1 + $0xb0] sm:$0xff]   ;;  %v1711_v35 = vld [vmem:[%s2285_s1 + $0xb8] sm:$0xff]   ;;  %v16_v37 = vld [vmem:[%s2286_s0 + $0x8] sm:$0xff] }
   0xd   :  { %1556 = vmatpush3.bf16.msra.mxu1 %v1691_v11  ;;  %959 = vmatprep.mubr.bf16.mxu0 %v1353_v34  ;;  %v20_v38 = vld [vmem:[%s2286_s0 + $0x28] sm:$0xff]  ;;  %v1713_v41 = vld [vmem:[%s2285_s1 + $0x100] sm:$0xff]   ;;  %v1718_v58 = vld [vmem:[%s2285_s1 + $0x190] sm:$0xff]  }
   0xe   :  { %1557 = vmatprep.subr.bf16.mxu1 %v1694_v14  ;;  %v1354_v39 = vcombine.low %v16_v37, %v20_v38  ;;  %v1355_v40 = vcombine.high %v16_v37, %v20_v38  ;;  %v1714_v43 = vld [vmem:[%s2285_s1 + $0x180] sm:$0xff]   ;;  %v1715_v47 = vld [vmem:[%s2285_s1 + $0x148] sm:$0xff]   ;;  %v1719_v59 = vld [vmem:[%s2285_s1 + $0x150] sm:$0xff]  }
   0xf   :  { %1494 = vmatpush3.bf16.msra.mxu0 %v1693_v13  ;;  %v23_v44 = vld [vmem:[%s2286_s0 + $0x40] sm:$0xff]  ;;  %v24_v48 = vld [vmem:[%s2286_s0 + $0x48] sm:$0xff]  ;;  %v1720_v63 = vld [vmem:[%s2285_s1 + $0x110] sm:$0xff]  }
  0x10   :  { %1495 = vmatprep.subr.bf16.mxu0 %v1696_v16  ;;  %v27_v45 = vld [vmem:[%s2286_s0 + $0x60] sm:$0xff]  ;;  %1056 = vmatprep.mubr.bf16.mxu1 %v1355_v40  ;;  %v28_v49 = vld [vmem:[%s2286_s0 + $0x68] sm:$0xff]  ;;  %v1721_v0 = vld [vmem:[%s2285_s1 + $0x198] sm:$0xff]  }
  0x11   :  { %1558 = vmatpush3.bf16.msra.mxu1 %v1695_v15  ;;  %v1361_v46 = vcombine.high %v23_v44, %v27_v45  ;;  %v1360_v50 = vcombine.low %v23_v44, %v27_v45  ;;  %v1363_v51 = vcombine.high %v24_v48, %v28_v49  ;;  %v1716_v52 = vld [vmem:[%s2285_s1 + $0x108] sm:$0xff]   ;;  %v31_v54 = vld [vmem:[%s2286_s0 + $0x80] sm:$0xff]  ;;  %v1362_v56 = vcombine.low %v24_v48, %v28_v49  ;;  %v1722_v4 = vld [vmem:[%s2285_s1 + $0x158] sm:$0xff]  }
  0x12   :  { %1559 = vmatprep.subr.bf16.mxu1 %v1698_v18  ;;  %v1717_v53 = vld [vmem:[%s2285_s1 + $0x188] sm:$0xff]   ;;  %v35_v55 = vld [vmem:[%s2286_s0 + $0xa0] sm:$0xff]  ;;  %v1724_v9 = vld [vmem:[%s2285_s1 + $0x118] sm:$0xff]  }
  0x13   :  { %1496 = vmatpush3.bf16.msra.mxu0 %v1697_v17  ;;  %v1369_v57 = vcombine.high %v31_v54, %v35_v55  ;;  %v32_v60 = vld [vmem:[%s2286_s0 + $0x88] sm:$0xff]  ;;  %v39_v1 = vld [vmem:[%s2286_s0 + $0xc0] sm:$0xff]  ;;  %v1368_v3 = vcombine.low %v31_v54, %v35_v55  ;;  %v1740_v44 = vld [vmem:[%s2285_s1 + $0x138] sm:$0xff]  }
  0x14   :  { %1497 = vmatprep.subr.bf16.mxu0 %v1700_v20  ;;  %v36_v61 = vld [vmem:[%s2286_s0 + $0xa8] sm:$0xff]  ;;  %v43_v2 = vld [vmem:[%s2286_s0 + $0xe0] sm:$0xff]  ;;  %v1735_v49 = vld [vmem:[%s2285_s1 + $0x1d0] sm:$0xff]  }
  0x15   :  { %1560 = vmatpush3.bf16.msra.mxu1 %v1699_v19  ;;  %v1371_v62 = vcombine.high %v32_v60, %v36_v61  ;;  %v1377_v5 = vcombine.high %v39_v1, %v43_v2  ;;  %v40_v6 = vld [vmem:[%s2286_s0 + $0xc8] sm:$0xff]  ;;  %v1370_v8 = vcombine.low %v32_v60, %v36_v61  ;;  %v1723_v10 = vld [vmem:[%s2285_s1 + $0x1a0] sm:$0xff]   ;;  %v1376_v16 = vcombine.low %v39_v1, %v43_v2  ;;  %v1737_v54 = vld [vmem:[%s2285_s1 + $0x1d8] sm:$0xff]  }
  0x16   :  { %1561 = vmatprep.subr.bf16.mxu1 %v1702_v22  ;;  %v44_v7 = vld [vmem:[%s2286_s0 + $0xe8] sm:$0xff]  ;;  %v47_v12 = vld [vmem:[%s2286_s0 + $0x100] sm:$0xff]  ;;  %v17_v61 = vld [vmem:[%s2286_s0 + $0x10] sm:$0xff] }
  0x17   :  { %1498 = vmatpush3.bf16.msra.mxu0 %v1701_v21  ;;  %v1379_v11 = vcombine.high %v40_v6, %v44_v7  ;;  %v1726_v13 = vld [vmem:[%s2285_s1 + $0x160] sm:$0xff]   ;;  %v1725_v15 = vld [vmem:[%s2285_s1 + $0x1a8] sm:$0xff]   ;;  %v1378_v21 = vcombine.low %v40_v6, %v44_v7  ;;  %v1742_v2 = vld [vmem:[%s2285_s1 + $0x1f0] ss:$0 sps:$4 sm:$0xff]  }
  0x18   :  { %1499 = vmatprep.subr.bf16.mxu0 %v1704_v24  ;;  %v51_v14 = vld [vmem:[%s2286_s0 + $0x120] sm:$0xff]  ;;  %v48_v19 = vld [vmem:[%s2286_s0 + $0x108] sm:$0xff]  ;;  %v925_v7 = vsel %vm923_vm0, %v1742_v2, 0 }
  0x19   :  { %1562 = vmatpush3.bf16.msra.mxu1 %v1703_v23  ;;  %v1728_v17 = vld [vmem:[%s2285_s1 + $0x120] sm:$0xff]   ;;  %v1385_v18 = vcombine.high %v47_v12, %v51_v14  ;;  %v52_v20 = vld [vmem:[%s2286_s0 + $0x128] sm:$0xff]  ;;  %v1727_v23 = vld [vmem:[%s2285_s1 + $0x1b0] sm:$0xff]  }
  0x1a   :  { %1563 = vmatprep.subr.bf16.mxu1 %v1706_v26  ;;  %v1730_v22 = vld [vmem:[%s2285_s1 + $0x168] sm:$0xff]   ;;  %v1387_v24 = vcombine.high %v48_v19, %v52_v20  ;;  %v1386_v34 = vcombine.low %v48_v19, %v52_v20  ;;  %v63_v38 = vld [vmem:[%s2286_s0 + $0x180] sm:$0xff]  ;;  %v34_v19 = vld [vmem:[%s2286_s0 + $0x98] sm:$0xff] }
  0x1b   :  { %1500 = vmatpush3.bf16.msra.mxu0 %v1705_v25  ;;  %v55_v25 = vld [vmem:[%s2286_s0 + $0x140] sm:$0xff]  ;;  %v1732_v26 = vld [vmem:[%s2285_s1 + $0x128] sm:$0xff]   ;;  %v38_v20 = vld [vmem:[%s2286_s0 + $0xb8] sm:$0xff] }
  0x1c   :  { %1501 = vmatprep.subr.bf16.mxu0 %v1708_v28  ;;  %v1729_v28 = vld [vmem:[%s2285_s1 + $0x1b8] sm:$0xff]   ;;  %v56_v32 = vld [vmem:[%s2286_s0 + $0x148] sm:$0xff]  ;;  %v67_v40 = vld [vmem:[%s2286_s0 + $0x1a0] sm:$0xff] }
  0x1d   :  { %1564 = vmatpush3.bf16.msra.mxu1 %v1707_v27  ;;  %v59_v27 = vld [vmem:[%s2286_s0 + $0x160] sm:$0xff]  ;;  %v1401_v45 = vcombine.high %v63_v38, %v67_v40 }
  0x1e   :  { %1565 = vmatprep.subr.bf16.mxu1 %v1710_v30  ;;  %v1734_v30 = vld [vmem:[%s2285_s1 + $0x170] sm:$0xff]   ;;  %v1393_v31 = vcombine.high %v55_v25, %v59_v27 }
  0x1f   :  { %1502 = vmatpush3.bf16.msra.mxu0 %v1709_v29  ;;  %v1384_v29 = vcombine.low %v47_v12, %v51_v14  ;;  %v30_v12 = vld [vmem:[%s2286_s0 + $0x78] sm:$0xff] }
  0x20   :  { %1615 = vmatprep.subr.bf16.mxu0 %v1712_v36  ;;  %v1731_v36 = vld [vmem:[%s2285_s1 + $0x1c0] sm:$0xff]  }
  0x21   :  { %1566 = vmatpush3.bf16.msra.mxu1 %v1711_v35  ;;  %v1736_v35 = vld [vmem:[%s2285_s1 + $0x130] sm:$0xff]  }
  0x22   :  { %960 = vmatmul.mubr.bf16.vlgmr.msra.gmra.mrb[0].mxu0 %v1352_v33  ;;  %1218 = vmatprep.subr.bf16.mxu1 %v1743_v42  ;;  %v60_v33 = vld [vmem:[%s2286_s0 + $0x168] sm:$0xff] }
  0x23   :  { %1616 = vmatpush3.bf16.msra.mxu0 %v1713_v41  ;;  %967 = vmatprep.mubr.bf16.mxu0 %v1361_v46  ;;  %v1395_v37 = vcombine.high %v56_v32, %v60_v33  ;;  %v1733_v41 = vld [vmem:[%s2285_s1 + $0x1c8] sm:$0xff]   ;;  %v1394_v48 = vcombine.low %v56_v32, %v60_v33  ;;  %v53_v32 = vld [vmem:[%s2286_s0 + $0x130] sm:$0xff] }
  0x24   :  { %1057 = vmatmul.mubr.bf16.vlgmr.msra.gmra.mrb[0].mxu1 %v1354_v39  ;;  %1617 = vmatprep.subr.bf16.mxu0 %v1715_v47  ;;  %v1738_v39 = vld [vmem:[%s2285_s1 + $0x178] sm:$0xff]   ;;  %v64_v46 = vld [vmem:[%s2286_s0 + $0x188] sm:$0xff] }
  0x25   :  { %1219 = vmatpush1.bf16.msra.mxu1 %v1714_v43  ;;  %1064 = vmatprep.mubr.bf16.mxu1 %v1363_v51  ;;  %v1392_v43 = vcombine.low %v55_v25, %v59_v27  ;;  %v68_v47 = vld [vmem:[%s2286_s0 + $0x1a8] sm:$0xff]  ;;  %v71_v51 = vld [vmem:[%s2286_s0 + $0x1c0] sm:$0xff]  ;;  %v42_v27 = vld [vmem:[%s2286_s0 + $0xd8] sm:$0xff] }
  0x26   :  { %1220 = vmatprep.subr.bf16.mxu1 %v1743_v42 }
  0x27   :  { %1618 = vmatpush3.bf16.msra.mxu0 %v1716_v52  ;;  %v75_v52 = vld [vmem:[%s2286_s0 + $0x1e0] sm:$0xff] }
  0x28   :  { %1619 = vmatprep.subr.bf16.mxu0 %v1719_v59  ;;  %v1409_v55 = vcombine.high %v71_v51, %v75_v52  ;;  %v1739_v59 = vld [vmem:[%s2285_s1 + $0x1e0] sm:$0xff]  }
  0x29   :  { %1221 = vmatpush1.bf16.msra.mxu1 %v1717_v53  ;;  %v1400_v53 = vcombine.low %v63_v38, %v67_v40  ;;  %v61_v40 = vld [vmem:[%s2286_s0 + $0x170] sm:$0xff] }
  0x2a   :  { %968 = vmatmul.mubr.bf16.gmra.mrb[4].mxu0 %v1360_v50  ;;  %1222 = vmatprep.subr.bf16.mxu1 %v1743_v42  ;;  %v1403_v50 = vcombine.high %v64_v46, %v68_v47 }
  0x2b   :  { %975 = vmatprep.mubr.bf16.mxu0 %v1369_v57  ;;  %1620 = vmatpush3.bf16.msra.mxu0 %v1720_v63  ;;  %v76_v57 = vld [vmem:[%s2286_s0 + $0x1e8] sm:$0xff]  ;;  %v1408_v63 = vcombine.low %v71_v51, %v75_v52  ;;  %v66_v52 = vld [vmem:[%s2286_s0 + $0x198] sm:$0xff] }
  0x2c   :  { %1065 = vmatmul.mubr.bf16.gmra.mrb[4].mxu1 %v1362_v56  ;;  %1621 = vmatprep.subr.bf16.mxu0 %v1722_v4  ;;  %v72_v56 = vld [vmem:[%s2286_s0 + $0x1c8] sm:$0xff]  ;;  %v22_v4 = vld [vmem:[%s2286_s0 + $0x38] sm:$0xff] }
  0x2d   :  { %1223 = vmatpush1.bf16.msra.mxu1 %v1718_v58  ;;  %1072 = vmatprep.mubr.bf16.mxu1 %v1371_v62  ;;  %v1402_v58 = vcombine.low %v64_v46, %v68_v47  ;;  %v1411_v60 = vcombine.high %v72_v56, %v76_v57  ;;  %v21_v62 = vld [vmem:[%s2286_s0 + $0x30] sm:$0xff] }
  0x2e   :  { %1224 = vmatprep.subr.bf16.mxu1 %v1743_v42  ;;  %v1357_v1 = vcombine.high %v17_v61, %v21_v62 }
  0x2f   :  { %1622 = vmatpush3.bf16.msra.mxu0 %v1724_v9  ;;  %v29_v9 = vld [vmem:[%s2286_s0 + $0x70] sm:$0xff] }
  0x30   :  { %1623 = vmatprep.subr.bf16.mxu0 %v1726_v13 }
  0x31   :  { %1225 = vmatpush1.bf16.msra.mxu1 %v1721_v0  ;;  %v1741_v0 = vld [vmem:[%s2285_s1 + $0x1e8] sm:$0xff]  }
  0x32   :  { %976 = vmatmul.mubr.bf16.gmra.mrb[8].mxu0 %v1368_v3  ;;  %1226 = vmatprep.subr.bf16.mxu1 %v1743_v42  ;;  %v18_v3 = vld [vmem:[%s2286_s0 + $0x18] sm:$0xff] }
  0x33   :  { %983 = vmatprep.mubr.bf16.mxu0 %v1377_v5  ;;  %1624 = vmatpush3.bf16.msra.mxu0 %v1728_v17  ;;  %v1410_v5 = vcombine.low %v72_v56, %v76_v57  ;;  %v1359_v6 = vcombine.high %v18_v3, %v22_v4  ;;  %v1358_v13 = vcombine.low %v18_v3, %v22_v4  ;;  %v73_v56 = vld [vmem:[%s2286_s0 + $0x1d0] sm:$0xff]  ;;  %v2171_v3 = vld [vmem:[%s2287_s2] ss:$0 sm:$0xff] }
  0x34   :  { %1073 = vmatmul.mubr.bf16.gmra.mrb[8].mxu1 %v1370_v8  ;;  %1625 = vmatprep.subr.bf16.mxu0 %v1730_v22  ;;  %v25_v8 = vld [vmem:[%s2286_s0 + $0x50] sm:$0xff]  ;;  %v1375_v22 = vcombine.high %v34_v19, %v38_v20 }
  0x35   :  { %1227 = vmatpush1.bf16.msra.mxu1 %v1723_v10  ;;  %1080 = vmatprep.mubr.bf16.mxu1 %v1379_v11  ;;  %v1356_v10 = vcombine.low %v17_v61, %v21_v62  ;;  %v1365_v11 = vcombine.high %v25_v8, %v29_v9  ;;  %v1364_v17 = vcombine.low %v25_v8, %v29_v9  ;;  %v77_v57 = vld [vmem:[%s2286_s0 + $0x1f0] sm:$0xff]  ;;  %v78_v61 = vld [vmem:[%s2286_s0 + $0x1f8] sm:$0xff] }
  0x36   :  { %1228 = vmatprep.subr.bf16.mxu1 %v1743_v42 }
  0x37   :  { %1626 = vmatpush3.bf16.msra.mxu0 %v1732_v26 }
  0x38   :  { %1627 = vmatprep.subr.bf16.mxu0 %v1734_v30 }
  0x39   :  { %1229 = vmatpush1.bf16.msra.mxu1 %v1725_v15  ;;  %v33_v15 = vld [vmem:[%s2286_s0 + $0x90] sm:$0xff] }
  0x3a   :  { %984 = vmatmul.mubr.bf16.gmra.mrb[12].mxu0 %v1376_v16  ;;  %1230 = vmatprep.subr.bf16.mxu1 %v1743_v42  ;;  %v37_v16 = vld [vmem:[%s2286_s0 + $0xb0] sm:$0xff] }
  0x3b   :  { %991 = vmatprep.mubr.bf16.mxu0 %v1385_v18  ;;  %1628 = vmatpush3.bf16.msra.mxu0 %v1736_v35  ;;  %v1373_v18 = vcombine.high %v33_v15, %v37_v16  ;;  %v1372_v25 = vcombine.low %v33_v15, %v37_v16  ;;  %v50_v35 = vld [vmem:[%s2286_s0 + $0x118] sm:$0xff] }
  0x3c   :  { %1081 = vmatmul.mubr.bf16.gmra.mrb[12].mxu1 %v1378_v21  ;;  %1629 = vmatprep.subr.bf16.mxu0 %v1738_v39  ;;  %v57_v39 = vld [vmem:[%s2286_s0 + $0x150] sm:$0xff] }
  0x3d   :  { %1231 = vmatpush1.bf16.msra.mxu1 %v1727_v23  ;;  %1088 = vmatprep.mubr.bf16.mxu1 %v1387_v24  ;;  %v41_v23 = vld [vmem:[%s2286_s0 + $0xd0] sm:$0xff] }
  0x3e   :  { %1232 = vmatprep.subr.bf16.mxu1 %v1743_v42  ;;  %v45_v24 = vld [vmem:[%s2286_s0 + $0xf0] sm:$0xff] }
  0x3f   :  { %1630 = vmatpush3.bf16.msra.mxu0 %v1740_v44  ;;  %v1381_v26 = vcombine.high %v41_v23, %v45_v24  ;;  %v1380_v33 = vcombine.low %v41_v23, %v45_v24  ;;  %v58_v44 = vld [vmem:[%s2286_s0 + $0x158] sm:$0xff] }
  0x41   :  { %1233 = vmatpush1.bf16.msra.mxu1 %v1729_v28  ;;  %v46_v28 = vld [vmem:[%s2286_s0 + $0xf8] sm:$0xff] }
  0x42   :  { %992 = vmatmul.mubr.bf16.gmra.mrb[16].mxu0 %v1384_v29  ;;  %1234 = vmatprep.subr.bf16.mxu1 %v1743_v42  ;;  %v1374_v29 = vcombine.low %v34_v19, %v38_v20  ;;  %v1383_v30 = vcombine.high %v42_v27, %v46_v28 }
  0x43   :  { %999 = vmatprep.mubr.bf16.mxu0 %v1393_v31  ;;  %v49_v31 = vld [vmem:[%s2286_s0 + $0x110] sm:$0xff] }
  0x44   :  { %1089 = vmatmul.mubr.bf16.gmra.mrb[16].mxu1 %v1386_v34  ;;  %v1389_v34 = vcombine.high %v49_v31, %v53_v32 }
  0x45   :  { %1235 = vmatpush1.bf16.msra.mxu1 %v1731_v36  ;;  %1096 = vmatprep.mubr.bf16.mxu1 %v1395_v37  ;;  %v54_v36 = vld [vmem:[%s2286_s0 + $0x138] sm:$0xff]  ;;  %v1382_v37 = vcombine.low %v42_v27, %v46_v28 }
  0x46   :  { %1236 = vmatprep.subr.bf16.mxu1 %v1743_v42  ;;  %v1391_v38 = vcombine.high %v50_v35, %v54_v36  ;;  %v1390_v46 = vcombine.low %v50_v35, %v54_v36 }
  0x49   :  { %1237 = vmatpush1.bf16.msra.mxu1 %v1733_v41  ;;  %v1388_v41 = vcombine.low %v49_v31, %v53_v32 }
  0x4a   :  { %1000 = vmatmul.mubr.bf16.gmra.mrb[20].mxu0 %v1392_v43  ;;  %1238 = vmatprep.subr.bf16.mxu1 %v1743_v42  ;;  %v1397_v43 = vcombine.high %v57_v39, %v61_v40 }
  0x4b   :  { %1007 = vmatprep.mubr.bf16.mxu0 %v1401_v45  ;;  %v62_v45 = vld [vmem:[%s2286_s0 + $0x178] sm:$0xff] }
  0x4c   :  { %1097 = vmatmul.mubr.bf16.gmra.mrb[20].mxu1 %v1394_v48  ;;  %v1399_v47 = vcombine.high %v58_v44, %v62_v45  ;;  %v65_v48 = vld [vmem:[%s2286_s0 + $0x190] sm:$0xff] }
  0x4d   :  { %1239 = vmatpush1.bf16.msra.mxu1 %v1735_v49  ;;  %1104 = vmatprep.mubr.bf16.mxu1 %v1403_v50  ;;  %v69_v49 = vld [vmem:[%s2286_s0 + $0x1b0] sm:$0xff]  ;;  %v1396_v50 = vcombine.low %v57_v39, %v61_v40 }
  0x4e   :  { %1240 = vmatprep.subr.bf16.mxu1 %v1743_v42  ;;  %v1405_v51 = vcombine.high %v65_v48, %v69_v49 }
  0x51   :  { %1241 = vmatpush1.bf16.msra.mxu1 %v1737_v54  ;;  %v1398_v54 = vcombine.low %v58_v44, %v62_v45 }
  0x52   :  { %1008 = vmatmul.mubr.bf16.gmra.mrb[24].mxu0 %v1400_v53  ;;  %1242 = vmatprep.subr.bf16.mxu1 %v1743_v42  ;;  %v70_v53 = vld [vmem:[%s2286_s0 + $0x1b8] sm:$0xff] }
  0x53   :  { %1015 = vmatprep.mubr.bf16.mxu0 %v1409_v55  ;;  %v1407_v55 = vcombine.high %v66_v52, %v70_v53  ;;  %v1406_v62 = vcombine.low %v66_v52, %v70_v53 }
  0x54   :  { %1105 = vmatmul.mubr.bf16.gmra.mrb[24].mxu1 %v1402_v58  ;;  %v1404_v58 = vcombine.low %v65_v48, %v69_v49 }
  0x55   :  { %1243 = vmatpush1.bf16.msra.mxu1 %v1739_v59  ;;  %1112 = vmatprep.mubr.bf16.mxu1 %v1411_v60  ;;  %v1413_v59 = vcombine.high %v73_v56, %v77_v57  ;;  %v74_v60 = vld [vmem:[%s2286_s0 + $0x1d8] sm:$0xff] }
  0x56   :  { %1244 = vmatprep.subr.bf16.mxu1 %v1743_v42 }
  0x59   :  { %1245 = vmatpush1.bf16.msra.mxu1 %v1741_v0  ;;  %v1412_v0 = vcombine.low %v73_v56, %v77_v57 }
  0x5a   :  { %1016 = vmatmul.mubr.bf16.gmra.mrb[28].mxu0 %v1408_v63  ;;  %1246 = vmatprep.subr.bf16.mxu1 %v1743_v42  ;;  %v26_v42 = vld [vmem:[%s2286_s0 + $0x58] sm:$0xff]  ;;  %v1415_v63 = vcombine.high %v74_v60, %v78_v61 }
  0x5b   :  { %1153 = vmatprep.mubr.bf16.mxu0 %v1357_v1  ;;  %v1367_v14 = vcombine.high %v26_v42, %v30_v12  ;;  %v1366_v21 = vcombine.low %v26_v42, %v30_v12  ;;  %v1414_v1 = vcombine.low %v74_v60, %v78_v61 }
  0x5c   :  { %1113 = vmatmul.mubr.bf16.gmra.mrb[28].mxu1 %v1410_v5 }
  0x5d   :  { %1247 = vmatpush1.bf16.msra.mxu1 %v925_v7  ;;  %1479 = vmatprep.mubr.msk.bf16.mxu1 %vm898_vm1, %v1359_v6 }
  0x62   :  { %1154 = vmatmul.mubr.bf16.vlgmr.msra.gmra.mrb[32].mxu0 %v1356_v10 }
  0x63   :  { %1161 = vmatprep.mubr.bf16.mxu0 %v1365_v11 }
  0x64   :  { %1251 = vmatmul.mubr.bf16.vlgmr.msra.gmra.mrb[32].mxu1 %v1358_v13 }
  0x65   :  { %1480 = vmatprep.mubr.msk.bf16.mxu1 %vm898_vm1, %v1367_v14 }
  0x6a   :  { %1162 = vmatmul.mubr.bf16.gmra.mrb[36].mxu0 %v1364_v17 }
  0x6b   :  { %1169 = vmatprep.mubr.bf16.mxu0 %v1373_v18 }
  0x6c   :  { %1259 = vmatmul.mubr.bf16.gmra.mrb[36].mxu1 %v1366_v21 }
  0x6d   :  { %1481 = vmatprep.mubr.msk.bf16.mxu1 %vm898_vm1, %v1375_v22 }
  0x72   :  { %1170 = vmatmul.mubr.bf16.gmra.mrb[40].mxu0 %v1372_v25 }
  0x73   :  { %1177 = vmatprep.mubr.bf16.mxu0 %v1381_v26 }
  0x74   :  { %1267 = vmatmul.mubr.bf16.gmra.mrb[40].mxu1 %v1374_v29 }
  0x75   :  { %1482 = vmatprep.mubr.msk.bf16.mxu1 %vm898_vm1, %v1383_v30 }
  0x7a   :  { %1178 = vmatmul.mubr.bf16.gmra.mrb[44].mxu0 %v1380_v33 }
  0x7b   :  { %1185 = vmatprep.mubr.bf16.mxu0 %v1389_v34 }
  0x7c   :  { %1275 = vmatmul.mubr.bf16.gmra.mrb[44].mxu1 %v1382_v37 }
  0x7d   :  { %1483 = vmatprep.mubr.msk.bf16.mxu1 %vm898_vm1, %v1391_v38 }
  0x82   :  { %1186 = vmatmul.mubr.bf16.gmra.mrb[48].mxu0 %v1388_v41 }
  0x83   :  { %1193 = vmatprep.mubr.bf16.mxu0 %v1397_v43 }
  0x84   :  { %1283 = vmatmul.mubr.bf16.gmra.mrb[48].mxu1 %v1390_v46 }
  0x85   :  { %1484 = vmatprep.mubr.msk.bf16.mxu1 %vm898_vm1, %v1399_v47 }
  0x8a   :  { %1194 = vmatmul.mubr.bf16.gmra.mrb[52].mxu0 %v1396_v50 }
  0x8b   :  { %1201 = vmatprep.mubr.bf16.mxu0 %v1405_v51 }
  0x8c   :  { %1291 = vmatmul.mubr.bf16.gmra.mrb[52].mxu1 %v1398_v54 }
  0x8d   :  { %1485 = vmatprep.mubr.msk.bf16.mxu1 %vm898_vm1, %v1407_v55 }
  0x92   :  { %1202 = vmatmul.mubr.bf16.gmra.mrb[56].mxu0 %v1404_v58 }
  0x93   :  { %1209 = vmatprep.mubr.bf16.mxu0 %v1413_v59 }
  0x94   :  { %1299 = vmatmul.mubr.bf16.gmra.mrb[56].mxu1 %v1406_v62 }
  0x95   :  { %1486 = vmatprep.mubr.msk.bf16.mxu1 %vm898_vm1, %v1415_v63 }
  0x9a   :  { %1210 = vmatmul.mubr.bf16.gmra.mrb[60].mxu0 %v1412_v0 }
  0x9c   :  { %1307 = vmatmul.mubr.bf16.gmra.mrb[60].mxu1 %v1414_v1 }
  0xf5   :  { %v1503_v2 = vpop.f32.mrb[0].mxu0 }
  0xf6   :  { %v1504_v4 = vpop.f32.mrb[1].mxu0 }
  0xf7   :  { %v1505_v5 = vadd.f32 %v1504_v4, %v1503_v2  ;;  %v1506_v6 = vpop.f32.mrb[2].mxu0  ;;  %v1567_v7 = vpop.f32.mrb[0].mxu1 }
  0xf8   :  { %v1507_v8 = vpop.f32.mrb[3].mxu0  ;;  %v1568_v11 = vpop.f32.mrb[1].mxu1 }
  0xf9   :  { %v962_v9 = vadd.f32 %v1505_v5, %v2171_v3  ;;  %v1508_v10 = vadd.f32 %v1507_v8, %v1506_v6  ;;  %v1569_v42 = vadd.f32 %v1568_v11, %v1567_v7  ;;  %v1570_v12 = vpop.f32.mrb[2].mxu1 }
  0xfa   :  { %v1571_v14 = vpop.f32.mrb[3].mxu1 }
  0xfb   :  { %v965_v13 = vadd.f32 %v1508_v10, %v2171_v3  ;;  %v2175_v15 = vadd.f32 %v1569_v42, %v962_v9  ;;  %v1572_v16 = vadd.f32 %v1571_v14, %v1570_v12 }
  0xfd   :  { %v1509_v17 = vpop.f32.mrb[4].mxu0  ;;  %v2177_v18 = vadd.f32 %v1572_v16, %v965_v13 }
  0xfe   :  { %v1510_v19 = vpop.f32.mrb[5].mxu0 }
  0xff   :  { %v1511_v20 = vadd.f32 %v1510_v19, %v1509_v17  ;;  %v1512_v21 = vpop.f32.mrb[6].mxu0  ;;  %v1573_v22 = vpop.f32.mrb[4].mxu1 }
 0x100   :  { %v1513_v23 = vpop.f32.mrb[7].mxu0  ;;  %v1574_v26 = vpop.f32.mrb[5].mxu1 }
 0x101   :  { %v970_v24 = vadd.f32 %v1511_v20, %v2171_v3  ;;  %v1514_v25 = vadd.f32 %v1513_v23, %v1512_v21  ;;  %v1575_v27 = vadd.f32 %v1574_v26, %v1573_v22  ;;  %v1576_v28 = vpop.f32.mrb[6].mxu1 }
 0x102   :  { %v1577_v30 = vpop.f32.mrb[7].mxu1 }
 0x103   :  { %v973_v29 = vadd.f32 %v1514_v25, %v2171_v3  ;;  %v2181_v31 = vadd.f32 %v1575_v27, %v970_v24  ;;  %v1578_v32 = vadd.f32 %v1577_v30, %v1576_v28 }
 0x105   :  { %v1515_v33 = vpop.f32.mrb[8].mxu0  ;;  %v2183_v34 = vadd.f32 %v1578_v32, %v973_v29 }
 0x106   :  { %v1516_v35 = vpop.f32.mrb[9].mxu0 }
 0x107   :  { %v1517_v36 = vadd.f32 %v1516_v35, %v1515_v33  ;;  %v1518_v37 = vpop.f32.mrb[10].mxu0  ;;  %v1579_v38 = vpop.f32.mrb[8].mxu1 }
 0x108   :  { %v1519_v39 = vpop.f32.mrb[11].mxu0  ;;  %v1580_v43 = vpop.f32.mrb[9].mxu1 }
 0x109   :  { %v978_v40 = vadd.f32 %v1517_v36, %v2171_v3  ;;  %v1520_v41 = vadd.f32 %v1519_v39, %v1518_v37  ;;  %v1581_v44 = vadd.f32 %v1580_v43, %v1579_v38  ;;  %v1582_v45 = vpop.f32.mrb[10].mxu1 }
 0x10a   :  { %v1583_v47 = vpop.f32.mrb[11].mxu1 }
 0x10b   :  { %v981_v46 = vadd.f32 %v1520_v41, %v2171_v3  ;;  %v2187_v48 = vadd.f32 %v1581_v44, %v978_v40  ;;  %v1584_v49 = vadd.f32 %v1583_v47, %v1582_v45 }
 0x10d   :  { %v1521_v50 = vpop.f32.mrb[12].mxu0  ;;  %v2189_v51 = vadd.f32 %v1584_v49, %v981_v46 }
 0x10e   :  { %v1522_v52 = vpop.f32.mrb[13].mxu0 }
 0x10f   :  { %v1523_v53 = vadd.f32 %v1522_v52, %v1521_v50  ;;  %v1524_v54 = vpop.f32.mrb[14].mxu0  ;;  %v1585_v55 = vpop.f32.mrb[12].mxu1 }
 0x110   :  { %v1525_v56 = vpop.f32.mrb[15].mxu0  ;;  %v1586_v59 = vpop.f32.mrb[13].mxu1 }
 0x111   :  { %v986_v57 = vadd.f32 %v1523_v53, %v2171_v3  ;;  %v1526_v58 = vadd.f32 %v1525_v56, %v1524_v54  ;;  %v1587_v60 = vadd.f32 %v1586_v59, %v1585_v55  ;;  %v1588_v61 = vpop.f32.mrb[14].mxu1 }
 0x112   :  { %v1589_v63 = vpop.f32.mrb[15].mxu1 }
 0x113   :  { %v989_v62 = vadd.f32 %v1526_v58, %v2171_v3  ;;  %v2193_v0 = vadd.f32 %v1587_v60, %v986_v57  ;;  %v1590_v1 = vadd.f32 %v1589_v63, %v1588_v61 }
 0x115   :  { %v1527_v2 = vpop.f32.mrb[16].mxu0  ;;  %v2195_v4 = vadd.f32 %v1590_v1, %v989_v62 }
 0x116   :  { %v1528_v5 = vpop.f32.mrb[17].mxu0 }
 0x117   :  { %v1529_v6 = vadd.f32 %v1528_v5, %v1527_v2  ;;  %v1530_v7 = vpop.f32.mrb[18].mxu0  ;;  %v1591_v8 = vpop.f32.mrb[16].mxu1 }
 0x118   :  { %v1531_v9 = vpop.f32.mrb[19].mxu0  ;;  %v1592_v42 = vpop.f32.mrb[17].mxu1 }
 0x119   :  { %v994_v10 = vadd.f32 %v1529_v6, %v2171_v3  ;;  %v1532_v11 = vadd.f32 %v1531_v9, %v1530_v7  ;;  %v1593_v12 = vadd.f32 %v1592_v42, %v1591_v8  ;;  %v1594_v13 = vpop.f32.mrb[18].mxu1 }
 0x11a   :  { %v1595_v16 = vpop.f32.mrb[19].mxu1 }
 0x11b   :  { %v997_v14 = vadd.f32 %v1532_v11, %v2171_v3  ;;  %v2199_v17 = vadd.f32 %v1593_v12, %v994_v10  ;;  %v1596_v19 = vadd.f32 %v1595_v16, %v1594_v13 }
 0x11d   :  { %v1533_v20 = vpop.f32.mrb[20].mxu0  ;;  %v2201_v21 = vadd.f32 %v1596_v19, %v997_v14 }
 0x11e   :  { %v1534_v22 = vpop.f32.mrb[21].mxu0 }
 0x11f   :  { %v1535_v23 = vadd.f32 %v1534_v22, %v1533_v20  ;;  %v1536_v24 = vpop.f32.mrb[22].mxu0  ;;  %v1597_v25 = vpop.f32.mrb[20].mxu1 }
 0x120   :  { %v1537_v26 = vpop.f32.mrb[23].mxu0  ;;  %v1598_v29 = vpop.f32.mrb[21].mxu1 }
 0x121   :  { %v1002_v27 = vadd.f32 %v1535_v23, %v2171_v3  ;;  %v1538_v28 = vadd.f32 %v1537_v26, %v1536_v24  ;;  %v1599_v30 = vadd.f32 %v1598_v29, %v1597_v25  ;;  %v1600_v32 = vpop.f32.mrb[22].mxu1 }
 0x122   :  { %v1601_v35 = vpop.f32.mrb[23].mxu1 }
 0x123   :  { %v1005_v33 = vadd.f32 %v1538_v28, %v2171_v3  ;;  %v2205_v36 = vadd.f32 %v1599_v30, %v1002_v27  ;;  %v1602_v37 = vadd.f32 %v1601_v35, %v1600_v32 }
 0x125   :  { %v1539_v38 = vpop.f32.mrb[24].mxu0  ;;  %v2207_v39 = vadd.f32 %v1602_v37, %v1005_v33 }
 0x126   :  { %v1540_v40 = vpop.f32.mrb[25].mxu0 }
 0x127   :  { %v1541_v41 = vadd.f32 %v1540_v40, %v1539_v38  ;;  %v1542_v43 = vpop.f32.mrb[26].mxu0  ;;  %v1603_v44 = vpop.f32.mrb[24].mxu1 }
 0x128   :  { %v1543_v45 = vpop.f32.mrb[27].mxu0  ;;  %v1604_v49 = vpop.f32.mrb[25].mxu1 }
 0x129   :  { %v1010_v46 = vadd.f32 %v1541_v41, %v2171_v3  ;;  %v1544_v47 = vadd.f32 %v1543_v45, %v1542_v43  ;;  %v1605_v50 = vadd.f32 %v1604_v49, %v1603_v44  ;;  %v1606_v52 = vpop.f32.mrb[26].mxu1 }
 0x12a   :  { %v1607_v54 = vpop.f32.mrb[27].mxu1 }
 0x12b   :  { %v1013_v53 = vadd.f32 %v1544_v47, %v2171_v3  ;;  %v2211_v55 = vadd.f32 %v1605_v50, %v1010_v46  ;;  %v1608_v56 = vadd.f32 %v1607_v54, %v1606_v52 }
 0x12d   :  { %v1545_v57 = vpop.f32.mrb[28].mxu0  ;;  %v2213_v58 = vadd.f32 %v1608_v56, %v1013_v53 }
 0x12e   :  { %v1546_v59 = vpop.f32.mrb[29].mxu0 }
 0x12f   :  { %v1547_v60 = vadd.f32 %v1546_v59, %v1545_v57  ;;  %v1548_v61 = vpop.f32.mrb[30].mxu0  ;;  %v1609_v62 = vpop.f32.mrb[28].mxu1 }
 0x130   :  { %v1549_v63 = vpop.f32.mrb[31].mxu0  ;;  %v1610_v5 = vpop.f32.mrb[29].mxu1 }
 0x131   :  { %v1018_v1 = vadd.f32 %v1547_v60, %v2171_v3  ;;  %v1550_v2 = vadd.f32 %v1549_v63, %v1548_v61  ;;  %v1611_v6 = vadd.f32 %v1610_v5, %v1609_v62  ;;  %v1612_v7 = vpop.f32.mrb[30].mxu1 }
 0x132   :  { %v1613_v9 = vpop.f32.mrb[31].mxu1 }
 0x133   :  { %v1021_v8 = vadd.f32 %v1550_v2, %v2171_v3  ;;  %v2217_v10 = vadd.f32 %v1611_v6, %v1018_v1  ;;  %v1614_v11 = vadd.f32 %v1613_v9, %v1612_v7 }
 0x135   :  { %v1631_v42 = vpop.f32.mrb[32].mxu0  ;;  %v2219_v12 = vadd.f32 %v1614_v11, %v1021_v8 }
 0x136   :  { %v1632_v13 = vpop.f32.mrb[33].mxu0 }
 0x137   :  { %v1633_v14 = vadd.f32 %v1632_v13, %v1631_v42  ;;  %v1634_v16 = vpop.f32.mrb[34].mxu0  ;;  %v1252_v20 = vpop.f32.mrb[32].mxu1 }
 0x138   :  { %v1635_v19 = vpop.f32.mrb[35].mxu0  ;;  %v1254_v24 = vpop.f32.mrb[33].mxu1 }
 0x139   :  { %v1636_v22 = vadd.f32 %v1635_v19, %v1634_v16  ;;  %v1156_v23 = vadd.f32 %v1633_v14, %v2175_v15  ;;  %v1255_v25 = vpop.f32.mrb[34].mxu1 }
 0x13a   :  { %v1257_v27 = vpop.f32.mrb[35].mxu1 }
 0x13b   :  { %v1253_v26 = vadd.f32 %v1252_v20, %v1156_v23  ;;  %v1159_v3 = vadd.f32 %v1636_v22, %v2177_v18 }
 0x13d   :  { %v1315_v28 = vmax.f32 %v1253_v26, 0.0  ;;  %v1256_v29 = vadd.f32 %v1255_v25, %v1159_v3  ;;  %v1637_v30 = vpop.f32.mrb[36].mxu0 }
 0x13e   :  { %v1638_v32 = vpop.f32.mrb[37].mxu0 }
 0x13f   :  { %1331 = vst [vmem:[%s2288_s3] sm:$0xff] %v1315_v28  ;;  %v1316_v33 = vmax.f32 %v1256_v29, 0.0  ;;  %v1639_v35 = vadd.f32 %v1638_v32, %v1637_v30  ;;  %v1640_v37 = vpop.f32.mrb[38].mxu0  ;;  %v1260_v40 = vpop.f32.mrb[36].mxu1 }
 0x140   :  { %v1641_v38 = vpop.f32.mrb[39].mxu0  ;;  %v1262_v41 = vpop.f32.mrb[37].mxu1 }
 0x141   :  { %1332 = vst [vmem:[%s2288_s3 + $0x8] sm:$0xff] %v1316_v33  ;;  %v1642_v15 = vadd.f32 %v1641_v38, %v1640_v37  ;;  %v1164_v18 = vadd.f32 %v1639_v35, %v2181_v31  ;;  %v1263_v43 = vpop.f32.mrb[38].mxu1 }
 0x142   :  { %v1265_v46 = vpop.f32.mrb[39].mxu1 }
 0x143   :  { %v1261_v44 = vadd.f32 %v1260_v40, %v1164_v18  ;;  %v1167_v45 = vadd.f32 %v1642_v15, %v2183_v34 }
 0x145   :  { %v1317_v47 = vmax.f32 %v1261_v44, 0.0  ;;  %v1264_v49 = vadd.f32 %v1263_v43, %v1167_v45  ;;  %v1643_v50 = vpop.f32.mrb[40].mxu0 }
 0x146   :  { %v1644_v52 = vpop.f32.mrb[41].mxu0 }
 0x147   :  { %1333 = vst [vmem:[%s2288_s3 + $0x10] sm:$0xff] %v1317_v47  ;;  %v1318_v53 = vmax.f32 %v1264_v49, 0.0  ;;  %v1645_v54 = vadd.f32 %v1644_v52, %v1643_v50  ;;  %v1646_v56 = vpop.f32.mrb[42].mxu0  ;;  %v1268_v59 = vpop.f32.mrb[40].mxu1 }
 0x148   :  { %v1647_v57 = vpop.f32.mrb[43].mxu0  ;;  %v1270_v60 = vpop.f32.mrb[41].mxu1 }
 0x149   :  { %1334 = vst [vmem:[%s2288_s3 + $0x18] sm:$0xff] %v1318_v53  ;;  %v1648_v31 = vadd.f32 %v1647_v57, %v1646_v56  ;;  %v1172_v34 = vadd.f32 %v1645_v54, %v2187_v48  ;;  %v1271_v61 = vpop.f32.mrb[42].mxu1 }
 0x14a   :  { %v1273_v1 = vpop.f32.mrb[43].mxu1 }
 0x14b   :  { %v1269_v62 = vadd.f32 %v1268_v59, %v1172_v34  ;;  %v1175_v63 = vadd.f32 %v1648_v31, %v2189_v51 }
 0x14d   :  { %v1319_v2 = vmax.f32 %v1269_v62, 0.0  ;;  %v1272_v5 = vadd.f32 %v1271_v61, %v1175_v63  ;;  %v1649_v6 = vpop.f32.mrb[44].mxu0 }
 0x14e   :  { %v1650_v7 = vpop.f32.mrb[45].mxu0 }
 0x14f   :  { %1335 = vst [vmem:[%s2288_s3 + $0x20] sm:$0xff] %v1319_v2  ;;  %v1320_v8 = vmax.f32 %v1272_v5, 0.0  ;;  %v1651_v9 = vadd.f32 %v1650_v7, %v1649_v6  ;;  %v1652_v11 = vpop.f32.mrb[46].mxu0  ;;  %v1276_v13 = vpop.f32.mrb[44].mxu1 }
 0x150   :  { %v1653_v42 = vpop.f32.mrb[47].mxu0  ;;  %v1278_v14 = vpop.f32.mrb[45].mxu1 }
 0x151   :  { %1336 = vst [vmem:[%s2288_s3 + $0x28] sm:$0xff] %v1320_v8  ;;  %v1654_v48 = vadd.f32 %v1653_v42, %v1652_v11  ;;  %v1180_v51 = vadd.f32 %v1651_v9, %v2193_v0  ;;  %v1279_v16 = vpop.f32.mrb[46].mxu1 }
 0x152   :  { %v1281_v22 = vpop.f32.mrb[47].mxu1 }
 0x153   :  { %v1277_v19 = vadd.f32 %v1276_v13, %v1180_v51  ;;  %v1183_v20 = vadd.f32 %v1654_v48, %v2195_v4 }
 0x155   :  { %v1321_v23 = vmax.f32 %v1277_v19, 0.0  ;;  %v1280_v24 = vadd.f32 %v1279_v16, %v1183_v20  ;;  %v1655_v25 = vpop.f32.mrb[48].mxu0 }
 0x156   :  { %v1656_v26 = vpop.f32.mrb[49].mxu0 }
 0x157   :  { %1337 = vst [vmem:[%s2288_s3 + $0x30] sm:$0xff] %v1321_v23  ;;  %v1322_v3 = vmax.f32 %v1280_v24, 0.0  ;;  %v1657_v27 = vadd.f32 %v1656_v26, %v1655_v25  ;;  %v1658_v28 = vpop.f32.mrb[50].mxu0  ;;  %v1284_v30 = vpop.f32.mrb[48].mxu1 }
 0x158   :  { %v1659_v29 = vpop.f32.mrb[51].mxu0  ;;  %v1286_v32 = vpop.f32.mrb[49].mxu1 }
 0x159   :  { %1338 = vst [vmem:[%s2288_s3 + $0x38] sm:$0xff] %v1322_v3  ;;  %v1660_v0 = vadd.f32 %v1659_v29, %v1658_v28  ;;  %v1188_v4 = vadd.f32 %v1657_v27, %v2199_v17  ;;  %v1287_v33 = vpop.f32.mrb[50].mxu1 }
 0x15a   :  { %v1289_v38 = vpop.f32.mrb[51].mxu1 }
 0x15b   :  { %v1285_v35 = vadd.f32 %v1284_v30, %v1188_v4  ;;  %v1191_v37 = vadd.f32 %v1660_v0, %v2201_v21 }
 0x15d   :  { %v1323_v40 = vmax.f32 %v1285_v35, 0.0  ;;  %v1288_v15 = vadd.f32 %v1287_v33, %v1191_v37  ;;  %v1661_v18 = vpop.f32.mrb[52].mxu0 }
 0x15e   :  { %v1662_v41 = vpop.f32.mrb[53].mxu0 }
 0x15f   :  { %1339 = vst [vmem:[%s2288_s3 + $0x40] sm:$0xff] %v1323_v40  ;;  %v1324_v43 = vmax.f32 %v1288_v15, 0.0  ;;  %v1663_v44 = vadd.f32 %v1662_v41, %v1661_v18  ;;  %v1664_v45 = vpop.f32.mrb[54].mxu0  ;;  %v1292_v47 = vpop.f32.mrb[52].mxu1 }
 0x160   :  { %v1665_v46 = vpop.f32.mrb[55].mxu0  ;;  %v1294_v49 = vpop.f32.mrb[53].mxu1 }
 0x161   :  { %1340 = vst [vmem:[%s2288_s3 + $0x48] sm:$0xff] %v1324_v43  ;;  %v1666_v17 = vadd.f32 %v1665_v46, %v1664_v45  ;;  %v1196_v21 = vadd.f32 %v1663_v44, %v2205_v36  ;;  %v1295_v50 = vpop.f32.mrb[54].mxu1 }
 0x162   :  { %v1297_v54 = vpop.f32.mrb[55].mxu1 }
 0x163   :  { %v1293_v52 = vadd.f32 %v1292_v47, %v1196_v21  ;;  %v1199_v53 = vadd.f32 %v1666_v17, %v2207_v39 }
 0x165   :  { %v1325_v56 = vmax.f32 %v1293_v52, 0.0  ;;  %v1296_v57 = vadd.f32 %v1295_v50, %v1199_v53  ;;  %v1667_v59 = vpop.f32.mrb[56].mxu0 }
 0x166   :  { %v1668_v31 = vpop.f32.mrb[57].mxu0 }
 0x167   :  { %1341 = vst [vmem:[%s2288_s3 + $0x50] sm:$0xff] %v1325_v56  ;;  %v1326_v34 = vmax.f32 %v1296_v57, 0.0  ;;  %v1669_v60 = vadd.f32 %v1668_v31, %v1667_v59  ;;  %v1670_v61 = vpop.f32.mrb[58].mxu0  ;;  %v1300_v63 = vpop.f32.mrb[56].mxu1 }
 0x168   :  { %v1671_v62 = vpop.f32.mrb[59].mxu0  ;;  %v1302_v1 = vpop.f32.mrb[57].mxu1 }
 0x169   :  { %1342 = vst [vmem:[%s2288_s3 + $0x58] sm:$0xff] %v1326_v34  ;;  %v1672_v36 = vadd.f32 %v1671_v62, %v1670_v61  ;;  %v1204_v39 = vadd.f32 %v1669_v60, %v2211_v55  ;;  %v1303_v2 = vpop.f32.mrb[58].mxu1 }
 0x16a   :  { %v1305_v7 = vpop.f32.mrb[59].mxu1 }
 0x16b   :  { %v1301_v5 = vadd.f32 %v1300_v63, %v1204_v39  ;;  %v1207_v6 = vadd.f32 %v1672_v36, %v2213_v58 }
 0x16d   :  { %v1327_v8 = vmax.f32 %v1301_v5, 0.0  ;;  %v1304_v9 = vadd.f32 %v1303_v2, %v1207_v6  ;;  %v1673_v11 = vpop.f32.mrb[60].mxu0 }
 0x16e   :  { %v1674_v42 = vpop.f32.mrb[61].mxu0 }
 0x16f   :  { %1343 = vst [vmem:[%s2288_s3 + $0x60] sm:$0xff] %v1327_v8  ;;  %v1328_v13 = vmax.f32 %v1304_v9, 0.0  ;;  %v1675_v48 = vadd.f32 %v1674_v42, %v1673_v11  ;;  %v1676_v51 = vpop.f32.mrb[62].mxu0  ;;  %v1308_v16 = vpop.f32.mrb[60].mxu1 }
 0x170   :  { %v1677_v14 = vpop.f32.mrb[63].mxu0  ;;  %v1310_v19 = vpop.f32.mrb[61].mxu1 }
 0x171   :  { %1344 = vst [vmem:[%s2288_s3 + $0x68] sm:$0xff] %v1328_v13  ;;  %v1678_v55 = vadd.f32 %v1677_v14, %v1676_v51  ;;  %v1212_v58 = vadd.f32 %v1675_v48, %v2217_v10  ;;  %v1311_v20 = vpop.f32.mrb[62].mxu1 }
 0x172   :  { %v1313_v24 = vpop.f32.mrb[63].mxu1 }
 0x173   :  { %v1309_v22 = vadd.f32 %v1308_v16, %v1212_v58  ;;  %v1215_v23 = vadd.f32 %v1678_v55, %v2219_v12 }
 0x175   :  { %v1329_v25 = vmax.f32 %v1309_v22, 0.0  ;;  %v1312_v26 = vadd.f32 %v1311_v20, %v1215_v23 }
 0x177   :  { %1345 = vst [vmem:[%s2288_s3 + $0x70] sm:$0xff] %v1329_v25  ;;  %v1330_v3 = vmax.f32 %v1312_v26, 0.0 }
 0x179   :  { %1346 = vst [vmem:[%s2288_s3 + $0x78] sm:$0xff] %v1330_v3 }

// kernel: convnet_forward.9
= control target key start
LH: loop header
LB: loop body
LE: loop exit
PB: predicated region body
PF: predicated region fallthrough
CT: control target
= control target key end

     0   :  { %v984_v35 = vmov 0.0   ;;  %vm985_vm0 = vmmov 0   ;;  %s1245_s1 = inlined_call_operand.vmem [shape: bf16[640,128], index: 1, kind: input, shape index: {}]   ;;  %s1246_s0 = inlined_call_operand.vmem [shape: bf16[8,640], index: 0, kind: input, shape index: {}]   ;;  %s1247_s3 = inlined_call_operand.vmem [shape: bf16[128,128], index: 3, kind: input, shape index: {}]   ;;  %s1248_s5 = inlined_call_operand.vmem [shape: bf16[128,128], index: 5, kind: input, shape index: {}]   ;;  %s1249_s2 = inlined_call_operand.vmem [shape: f32[1,128], index: 2, kind: input, shape index: {}]   ;;  %s1250_s4 = inlined_call_operand.vmem [shape: f32[1,128], index: 4, kind: input, shape index: {}]   ;;  %s1251_s6 = inlined_call_operand.vmem [shape: f32[1,128], index: 6, kind: input, shape index: {}]   ;;  %s1252_s7 = inlined_call_operand.vmem [shape: f32[8,128], index: 7, kind: output, shape index: {}]  }
   0x1   :  { %v923_v0 = vld [vmem:[%s1245_s1 + $0x40] sm:$0xff]   ;;  %v927_v4 = vld [vmem:[%s1245_s1 + $0x48] sm:$0xff]   ;;  %v931_v8 = vld [vmem:[%s1245_s1 + $0x50] sm:$0xff]  }
   0x2   :  { %v924_v1 = vld [vmem:[%s1245_s1] sm:$0xff]   ;;  %790 = vmatprep.subr.bf16.mxu0 %v923_v0  ;;  %v928_v5 = vld [vmem:[%s1245_s1 + $0x8] sm:$0xff]   ;;  %v932_v9 = vld [vmem:[%s1245_s1 + $0x10] sm:$0xff]  }
   0x3   :  { %v925_v2 = vld [vmem:[%s1245_s1 + $0xc0] sm:$0xff]   ;;  %791 = vmatpush3.bf16.msra.mxu0 %v924_v1  ;;  %v929_v6 = vld [vmem:[%s1245_s1 + $0xc8] sm:$0xff]   ;;  %v933_v10 = vld [vmem:[%s1245_s1 + $0xd0] sm:$0xff]  }
   0x4   :  { %v926_v3 = vld [vmem:[%s1245_s1 + $0x80] sm:$0xff]   ;;  %812 = vmatprep.subr.bf16.mxu1 %v925_v2  ;;  %792 = vmatprep.subr.bf16.mxu0 %v927_v4  ;;  %v930_v7 = vld [vmem:[%s1245_s1 + $0x88] sm:$0xff]   ;;  %v934_v11 = vld [vmem:[%s1245_s1 + $0x90] sm:$0xff]  }
   0x5   :  { %813 = vmatpush3.bf16.msra.mxu1 %v926_v3  ;;  %v935_v12 = vld [vmem:[%s1245_s1 + $0x58] sm:$0xff]   ;;  %v939_v16 = vld [vmem:[%s1245_s1 + $0x60] sm:$0xff]   ;;  %v943_v20 = vld [vmem:[%s1245_s1 + $0x68] sm:$0xff]  }
   0x6   :  { %814 = vmatprep.subr.bf16.mxu1 %v929_v6  ;;  %v936_v13 = vld [vmem:[%s1245_s1 + $0x18] sm:$0xff]   ;;  %v940_v17 = vld [vmem:[%s1245_s1 + $0x20] sm:$0xff]   ;;  %v944_v21 = vld [vmem:[%s1245_s1 + $0x28] sm:$0xff]  }
   0x7   :  { %793 = vmatpush3.bf16.msra.mxu0 %v928_v5  ;;  %v937_v14 = vld [vmem:[%s1245_s1 + $0xd8] sm:$0xff]   ;;  %v941_v18 = vld [vmem:[%s1245_s1 + $0xe0] sm:$0xff]   ;;  %v945_v22 = vld [vmem:[%s1245_s1 + $0xe8] sm:$0xff]  }
   0x8   :  { %794 = vmatprep.subr.bf16.mxu0 %v931_v8  ;;  %v938_v15 = vld [vmem:[%s1245_s1 + $0x98] sm:$0xff]   ;;  %v942_v19 = vld [vmem:[%s1245_s1 + $0xa0] sm:$0xff]   ;;  %v946_v23 = vld [vmem:[%s1245_s1 + $0xa8] sm:$0xff]  }
   0x9   :  { %815 = vmatpush3.bf16.msra.mxu1 %v930_v7  ;;  %v947_v24 = vld [vmem:[%s1245_s1 + $0x70] sm:$0xff]   ;;  %v951_v28 = vld [vmem:[%s1245_s1 + $0x78] sm:$0xff]   ;;  %v27_v31 = vld [vmem:[%s1246_s0] sm:$0xff] }
   0xa   :  { %816 = vmatprep.subr.bf16.mxu1 %v933_v10  ;;  %v948_v25 = vld [vmem:[%s1245_s1 + $0x30] sm:$0xff]   ;;  %v952_v29 = vld [vmem:[%s1245_s1 + $0x38] sm:$0xff]   ;;  %v727_v32 = vcombine.low %v27_v31, %v27_v31  ;;  %v728_v33 = vcombine.high %v27_v31, %v27_v31  ;;  %v28_v36 = vld [vmem:[%s1246_s0 + $0x8] sm:$0xff] }
   0xb   :  { %795 = vmatpush3.bf16.msra.mxu0 %v932_v9  ;;  %v949_v26 = vld [vmem:[%s1245_s1 + $0xf0] sm:$0xff]   ;;  %v953_v30 = vld [vmem:[%s1245_s1 + $0xf8] sm:$0xff]   ;;  %v729_v37 = vcombine.low %v28_v36, %v28_v36  ;;  %v730_v38 = vcombine.high %v28_v36, %v28_v36  ;;  %v960_v39 = vld [vmem:[%s1245_s1 + $0x100] sm:$0xff]  }
   0xc   :  { %796 = vmatprep.subr.bf16.mxu0 %v935_v12  ;;  %v950_v27 = vld [vmem:[%s1245_s1 + $0xb0] sm:$0xff]   ;;  %v957_v34 = vld [vmem:[%s1245_s1 + $0xb8] sm:$0xff]   ;;  %407 = vmatprep.mubr.bf16.mxu0 %v728_v33  ;;  %v961_v40 = vld [vmem:[%s1245_s1 + $0x108] sm:$0xff]  }
   0xd   :  { %817 = vmatpush3.bf16.msra.mxu1 %v934_v11  ;;  %447 = vmatprep.mubr.bf16.mxu1 %v730_v38  ;;  %v962_v41 = vld [vmem:[%s1245_s1 + $0x110] sm:$0xff]   ;;  %v963_v42 = vld [vmem:[%s1245_s1 + $0x118] sm:$0xff]   ;;  %v964_v43 = vld [vmem:[%s1245_s1 + $0x120] sm:$0xff]  }
   0xe   :  { %818 = vmatprep.subr.bf16.mxu1 %v937_v14  ;;  %v965_v44 = vld [vmem:[%s1245_s1 + $0x128] sm:$0xff]   ;;  %v966_v45 = vld [vmem:[%s1245_s1 + $0x130] sm:$0xff]   ;;  %v967_v46 = vld [vmem:[%s1245_s1 + $0x138] sm:$0xff]  }
   0xf   :  { %797 = vmatpush3.bf16.msra.mxu0 %v936_v13  ;;  %v956_v47 = vld [vmem:[%s1246_s0 + $0x10] ss:$0 sps:$4 sm:$0xff]   ;;  %v968_v48 = vld [vmem:[%s1247_s3] sm:$0xff]   ;;  %v969_v49 = vld [vmem:[%s1247_s3 + $0x8] sm:$0xff]  }
  0x10   :  { %798 = vmatprep.subr.bf16.mxu0 %v939_v16  ;;  %v970_v50 = vld [vmem:[%s1247_s3 + $0x10] sm:$0xff]   ;;  %v971_v51 = vld [vmem:[%s1247_s3 + $0x18] sm:$0xff]   ;;  %v972_v52 = vld [vmem:[%s1247_s3 + $0x20] sm:$0xff]  }
  0x11   :  { %819 = vmatpush3.bf16.msra.mxu1 %v938_v15  ;;  %v973_v53 = vld [vmem:[%s1247_s3 + $0x28] sm:$0xff]   ;;  %v974_v54 = vld [vmem:[%s1247_s3 + $0x30] sm:$0xff]   ;;  %v975_v55 = vld [vmem:[%s1247_s3 + $0x38] sm:$0xff]  }
  0x12   :  { %820 = vmatprep.subr.bf16.mxu1 %v941_v18  ;;  %v976_v56 = vld [vmem:[%s1248_s5] sm:$0xff]   ;;  %v977_v57 = vld [vmem:[%s1248_s5 + $0x8] sm:$0xff]   ;;  %v978_v58 = vld [vmem:[%s1248_s5 + $0x10] sm:$0xff]  }
  0x13   :  { %799 = vmatpush3.bf16.msra.mxu0 %v940_v17  ;;  %v979_v59 = vld [vmem:[%s1248_s5 + $0x18] sm:$0xff]   ;;  %v980_v60 = vld [vmem:[%s1248_s5 + $0x20] sm:$0xff]   ;;  %v981_v61 = vld [vmem:[%s1248_s5 + $0x28] sm:$0xff]  }
  0x14   :  { %800 = vmatprep.subr.bf16.mxu0 %v943_v20  ;;  %v726_v63 = vld [vmem:[%s1249_s2] ss:$0 sm:$0xff]  ;;  %v982_v18 = vld [vmem:[%s1248_s5 + $0x30] sm:$0xff]  }
  0x15   :  { %821 = vmatpush3.bf16.msra.mxu1 %v942_v19  ;;  %v983_v19 = vld [vmem:[%s1248_s5 + $0x38] sm:$0xff]   ;;  %v772_v20 = vld [vmem:[%s1250_s4] ss:$0 sm:$0xff] }
  0x16   :  { %822 = vmatprep.subr.bf16.mxu1 %v945_v22 }
  0x17   :  { %801 = vmatpush3.bf16.msra.mxu0 %v944_v21 }
  0x18   :  { %802 = vmatprep.subr.bf16.mxu0 %v947_v24 }
  0x19   :  { %823 = vmatpush3.bf16.msra.mxu1 %v946_v23 }
  0x1a   :  { %824 = vmatprep.subr.bf16.mxu1 %v949_v26 }
  0x1b   :  { %803 = vmatpush3.bf16.msra.mxu0 %v948_v25 }
  0x1c   :  { %804 = vmatprep.subr.bf16.mxu0 %v951_v28  ;;  %v781_v28 = vld [vmem:[%s1251_s6] ss:$0 sm:$0xff] }
  0x1d   :  { %825 = vmatpush3.bf16.msra.mxu1 %v950_v27 }
  0x1e   :  { %826 = vmatprep.subr.bf16.mxu1 %v953_v30 }
  0x1f   :  { %805 = vmatpush3.bf16.msra.mxu0 %v952_v29 }
  0x20   :  { %861 = vmatprep.subr.bf16.mxu0 %v984_v35 }
  0x21   :  { %827 = vmatpush3.bf16.msra.mxu1 %v957_v34 }
  0x22   :  { %408 = vmatmul.mubr.bf16.vlgmr.msra.gmra.mrb[0].mxu0 %v727_v32  ;;  %881 = vmatprep.subr.bf16.mxu1 %v984_v35 }
  0x23   :  { %862 = vmatpush3.bf16.msra.mxu0 %v960_v39  ;;  %877 = vmatprep.mubr.msk.bf16.mxu0 %vm985_vm0, %v984_v35 }
  0x24   :  { %448 = vmatmul.mubr.bf16.vlgmr.msra.gmra.mrb[0].mxu1 %v729_v37  ;;  %863 = vmatprep.subr.bf16.mxu0 %v984_v35 }
  0x25   :  { %897 = vmatprep.mubr.msk.bf16.mxu1 %vm985_vm0, %v984_v35  ;;  %882 = vmatpush3.bf16.msra.mxu1 %v968_v48 }
  0x26   :  { %883 = vmatprep.subr.bf16.mxu1 %v984_v35 }
  0x27   :  { %864 = vmatpush3.bf16.msra.mxu0 %v961_v40 }
  0x28   :  { %865 = vmatprep.subr.bf16.mxu0 %v984_v35 }
  0x29   :  { %884 = vmatpush3.bf16.msra.mxu1 %v969_v49 }
  0x2a   :  { %885 = vmatprep.subr.bf16.mxu1 %v984_v35 }
  0x2b   :  { %866 = vmatpush3.bf16.msra.mxu0 %v962_v41 }
  0x2c   :  { %867 = vmatprep.subr.bf16.mxu0 %v984_v35 }
  0x2d   :  { %886 = vmatpush3.bf16.msra.mxu1 %v970_v50 }
  0x2e   :  { %887 = vmatprep.subr.bf16.mxu1 %v984_v35 }
  0x2f   :  { %868 = vmatpush3.bf16.msra.mxu0 %v963_v42 }
  0x30   :  { %869 = vmatprep.subr.bf16.mxu0 %v984_v35 }
  0x31   :  { %888 = vmatpush3.bf16.msra.mxu1 %v971_v51 }
  0x32   :  { %889 = vmatprep.subr.bf16.mxu1 %v984_v35 }
  0x33   :  { %870 = vmatpush3.bf16.msra.mxu0 %v964_v43 }
  0x34   :  { %871 = vmatprep.subr.bf16.mxu0 %v984_v35 }
  0x35   :  { %890 = vmatpush3.bf16.msra.mxu1 %v972_v52 }
  0x36   :  { %891 = vmatprep.subr.bf16.mxu1 %v984_v35 }
  0x37   :  { %872 = vmatpush3.bf16.msra.mxu0 %v965_v44 }
  0x38   :  { %873 = vmatprep.subr.bf16.mxu0 %v984_v35 }
  0x39   :  { %892 = vmatpush3.bf16.msra.mxu1 %v973_v53 }
  0x3a   :  { %893 = vmatprep.subr.bf16.mxu1 %v984_v35 }
  0x3b   :  { %874 = vmatpush3.bf16.msra.mxu0 %v966_v45 }
  0x3c   :  { %875 = vmatprep.subr.bf16.mxu0 %v984_v35 }
  0x3d   :  { %894 = vmatpush3.bf16.msra.mxu1 %v974_v54 }
  0x3e   :  { %895 = vmatprep.subr.bf16.mxu1 %v984_v35 }
  0x3f   :  { %876 = vmatpush3.bf16.msra.mxu0 %v967_v46 }
  0x40   :  { %901 = vmatprep.subr.bf16.mxu0 %v984_v35 }
  0x41   :  { %896 = vmatpush3.bf16.msra.mxu1 %v975_v55 }
  0x42   :  { %878 = vmatmul.mubr.bf16.vlgmr.msra.gmra.mrb[4].mxu0 %v956_v47 }
  0x43   :  { %917 = vmatprep.mubr.msk.bf16.mxu0 %vm985_vm0, %v984_v35  ;;  %902 = vmatpush3.bf16.msra.mxu0 %v976_v56 }
  0x44   :  { %903 = vmatprep.subr.bf16.mxu0 %v984_v35 }
  0x47   :  { %904 = vmatpush3.bf16.msra.mxu0 %v977_v57 }
  0x48   :  { %905 = vmatprep.subr.bf16.mxu0 %v984_v35 }
  0x4b   :  { %906 = vmatpush3.bf16.msra.mxu0 %v978_v58 }
  0x4c   :  { %907 = vmatprep.subr.bf16.mxu0 %v984_v35 }
  0x4f   :  { %908 = vmatpush3.bf16.msra.mxu0 %v979_v59 }
  0x50   :  { %909 = vmatprep.subr.bf16.mxu0 %v984_v35 }
  0x53   :  { %910 = vmatpush3.bf16.msra.mxu0 %v980_v60 }
  0x54   :  { %911 = vmatprep.subr.bf16.mxu0 %v984_v35 }
  0x57   :  { %912 = vmatpush3.bf16.msra.mxu0 %v981_v61 }
  0x58   :  { %913 = vmatprep.subr.bf16.mxu0 %v984_v35 }
  0x5b   :  { %914 = vmatpush3.bf16.msra.mxu0 %v982_v18 }
  0x5c   :  { %915 = vmatprep.subr.bf16.mxu0 %v984_v35 }
  0x5f   :  { %916 = vmatpush3.bf16.msra.mxu0 %v983_v19 }
  0xf5   :  { %v806_v62 = vpop.f32.mrb[0].mxu0 }
  0xf6   :  { %v807_v0 = vpop.f32.mrb[1].mxu0 }
  0xf7   :  { %v808_v1 = vadd.f32 %v807_v0, %v806_v62  ;;  %v809_v2 = vpop.f32.mrb[2].mxu0  ;;  %v828_v3 = vpop.f32.mrb[0].mxu1 }
  0xf8   :  { %v810_v4 = vpop.f32.mrb[3].mxu0  ;;  %v829_v5 = vpop.f32.mrb[1].mxu1 }
  0xf9   :  { %v410_v6 = vadd.f32 %v808_v1, %v726_v63  ;;  %v830_v7 = vadd.f32 %v829_v5, %v828_v3  ;;  %v831_v8 = vpop.f32.mrb[2].mxu1 }
  0xfa   :  { %v832_v9 = vpop.f32.mrb[3].mxu1 }
  0xfb   :  { %v450_v10 = vadd.f32 %v830_v7, %v410_v6 }
 0x115   :  { %v489_v11 = vpop.f32.mrb[4].mxu0 }
 0x116   :  { %v490_v12 = vadd.f32 %v489_v11, %v450_v10  ;;  %v879_v13 = vpop.f32.mrb[5].mxu0 }
 0x117   :  { %v492_v14 = vpop.f32.mrb[6].mxu0 }
 0x118   :  { %v495_v15 = vmax.f32 %v490_v12, 0.0  ;;  %v880_v16 = vpop.f32.mrb[7].mxu0 }
 0x11a   :  { %v496_v17 = vpack.c.bf16 %v495_v15, %v495_v15 }
 0x11c   :  { %898 = vmatmul.mubr.bf16.vlgmr.msra.gmra.mrb[4].mxu1 %v496_v17 }
 0x1ef   :  { %v602_v21 = vpop.f32.mrb[4].mxu1 }
 0x1f0   :  { %v603_v22 = vadd.f32 %v772_v20, %v602_v21  ;;  %v899_v23 = vpop.f32.mrb[5].mxu1 }
 0x1f1   :  { %v605_v24 = vpop.f32.mrb[6].mxu1 }
 0x1f2   :  { %v608_v25 = vmax.f32 %v603_v22, 0.0  ;;  %v900_v26 = vpop.f32.mrb[7].mxu1 }
 0x1f4   :  { %v609_v27 = vpack.c.bf16 %v608_v25, %v608_v25 }
 0x1f6   :  { %918 = vmatmul.mubr.bf16.vlgmr.msra.gmra.mrb[8].mxu0 %v609_v27 }
 0x2c9   :  { %v715_v29 = vpop.f32.mrb[8].mxu0 }
 0x2ca   :  { %v716_v30 = vadd.f32 %v781_v28, %v715_v29  ;;  %v919_v31 = vpop.f32.mrb[9].mxu0 }
 0x2cb   :  { %v718_v32 = vpop.f32.mrb[10].mxu0 }
 0x2cc   :  { %721 = vst [vmem:[%s1252_s7] sm:$0xff] %v716_v30  ;;  %v920_v33 = vpop.f32.mrb[11].mxu0 }

</bundles_post_ra>
